<compile_context>
chip_gen: v6e
topology: v6e:2x2x1
jax: 0.10.0
libtpu: 0.0.40
codegen_flags: <defaults>
</compile_context>

<pallas_src>
import functools

import jax
import jax.numpy as jnp
from jax.experimental import pallas as pl
from jax.experimental.pallas import tpu as pltpu


def _attentive_pooling2_kernel(q_ref, a_ref, u_ref,
                               sigq_ref, pvec_ref, siga_ref, cvec_ref,
                               *, mxu_dtype):
    """One block of `block_b` batch elements per grid step; fully fused."""
    tb, lq, e_dim = q_ref.shape
    _, la, _ = a_ref.shape

    q = q_ref[...]                       # (TB, Lq, E)
    a = a_ref[...]                       # (TB, La, E)
    u = u_ref[...]                       # (E, E)

    # MXU operands in mxu_dtype (bf16 on v6e/v7x); accumulation stays f32.
    qm = q.astype(mxu_dtype)
    am = a.astype(mxu_dtype)
    um = u.astype(mxu_dtype)

    # ---- Q @ U: collapse (TB, Lq) rows into ONE big MXU matmul (free reshape,
    #      lane dim unchanged). ----
    qu = jnp.dot(qm.reshape(tb * lq, e_dim), um,
                 preferred_element_type=jnp.float32)              # (TB*Lq, E) f32

    # ---- G = tanh((Q U) A^T), batched last-dim contraction over the block. ----
    # G, the exact ==0 mask, tanh and the softmax all stay in f32 (mask must match
    # the f32 PyTorch semantics; v5e has no bf16 VPU/EUP path anyway).
    g = jnp.tanh(jnp.einsum('bqe,bae->bqa',
                            qu.reshape(tb, lq, e_dim).astype(mxu_dtype), am,
                            preferred_element_type=jnp.float32))  # (TB, Lq, La) f32

    g_q = jnp.max(g, axis=2)             # (TB, Lq)
    g_a = jnp.max(g, axis=1)             # (TB, La)

    def masked_softmax(x):
        # masked_fill(x == 0, -1e9) + numerically-stable softmax over the last dim
        # (matches F.softmax(..., dim=1) on 2-D input).
        x = jnp.where(x == 0.0, -1e9, x)
        m = jnp.max(x, axis=-1, keepdims=True)
        ex = jnp.exp(x - m)
        s = jnp.sum(ex, axis=-1, keepdims=True)
        # EUP vrcp (separate issue slot -> frees the VALU) + one Newton-Raphson
        # step to restore full f32 accuracy of the normalization.
        r = pl.reciprocal(s, approx=True)
        r = r * (2.0 - s * r)
        return ex * r

    sigma_q = masked_softmax(g_q)        # (TB, Lq) f32
    sigma_a = masked_softmax(g_a)        # (TB, La) f32

    # Attention-weighted pooled vectors on the VPU (lane-dense over E), f32 accum.
    prot_vec = jnp.sum(sigma_q[:, :, None] * q.astype(jnp.float32), axis=1)  # (TB, E)
    chem_vec = jnp.sum(sigma_a[:, :, None] * a.astype(jnp.float32), axis=1)  # (TB, E)

    sigq_ref[...] = sigma_q.astype(sigq_ref.dtype)
    pvec_ref[...] = prot_vec.astype(pvec_ref.dtype)
    siga_ref[...] = sigma_a.astype(siga_ref.dtype)
    cvec_ref[...] = chem_vec.astype(cvec_ref.dtype)


def _round_up(x, m):
    return (x + m - 1) // m * m


def _vmem_bytes_per_step(b, lq, la, e, in_isz, out_isz):
    """Rough per-grid-step VMEM footprint for batch block b (double-buffered I/O)."""
    inputs = 2 * b * (lq + la) * e * in_isz            # Q, A blocks (x2 pipeline bufs)
    outputs = 2 * b * (lq + la + 2 * e) * out_isz      # 4 outputs (x2 pipeline bufs)
    u_param = 2 * e * e * in_isz                       # grid-invariant U (x2 bufs)
    interm = b * (2 * lq * e + la * e + lq * la) * 4   # qu, f32 copies, G (all f32)
    return inputs + outputs + u_param + interm


def _choose_block_b(batch, lq, la, e, in_isz, out_isz,
                    target_step_bytes, vmem_budget_bytes):
    """Sublane-aligned batch block sized by bytes, capped for VMEM and megacore."""
    per_b = (lq + la) * e * in_isz
    b = _round_up(max(1, target_step_bytes // per_b), 8)
    b = min(b, _round_up(batch, 8))                    # never exceed the padded batch
    # Keep >= 4 (resp. >= 2) grid steps when the batch allows it, so the "parallel"
    # grid axis can be sharded across both v7x TensorCores.
    if batch >= 32:
        b = min(b, max(8, (batch // 4) // 8 * 8))
    elif batch >= 16:
        b = min(b, max(8, (batch // 2) // 8 * 8))
    # Shrink (sublane-aligned steps) until the per-step VMEM estimate fits.
    while b > 8 and _vmem_bytes_per_step(b, lq, la, e, in_isz, out_isz) > vmem_budget_bytes:
        b -= 8
    return b


@functools.partial(jax.jit, static_argnames=("mxu_dtype", "target_step_bytes"))
def attentive_pooling2(protein, ligand, U, *, mxu_dtype=None,
                       target_step_bytes=2 << 20):
    B, Lq, E = protein.shape
    B2, La, E2 = ligand.shape
    assert B == B2 and E == E2, "protein/ligand must share batch and embedding dims"
    assert U.shape == (E, E)

    in_isz = protein.dtype.itemsize
    out_isz = protein.dtype.itemsize
    mxu = jnp.dtype(mxu_dtype) if mxu_dtype is not None else jnp.dtype(protein.dtype)

    # Byte-targeted batch block (multiple of 8); VMEM budget chosen to be safe on
    # v7x (64 MiB physical) while leaving headroom for compiler-internal scratch.
    block_b = _choose_block_b(B, Lq, La, E, in_isz, out_isz,
                              target_step_bytes, vmem_budget_bytes=24 << 20)
    B_pad = _round_up(B, block_b)
    grid = (B_pad // block_b,)

    if B_pad != B:
        pad = ((0, B_pad - B), (0, 0), (0, 0))
        protein_p = jnp.pad(protein, pad)
        ligand_p = jnp.pad(ligand, pad)
    else:
        protein_p, ligand_p = protein, ligand

    out_shape = (
        jax.ShapeDtypeStruct((B_pad, Lq), protein.dtype),   # sigma_q
        jax.ShapeDtypeStruct((B_pad, E), protein.dtype),    # prot_vec
        jax.ShapeDtypeStruct((B_pad, La), ligand.dtype),    # sigma_a
        jax.ShapeDtypeStruct((B_pad, E), ligand.dtype),     # chem_vec
    )

    grid_spec = pltpu.PrefetchScalarGridSpec(
        num_scalar_prefetch=0,
        grid=grid,
        in_specs=[
            pl.BlockSpec((block_b, Lq, E), lambda b: (b, 0, 0)),   # protein
            pl.BlockSpec((block_b, La, E), lambda b: (b, 0, 0)),   # ligand
            # U is grid-invariant; for very large E add pipeline_mode=pl.Buffered(1).
            pl.BlockSpec((E, E), lambda b: (0, 0)),
        ],
        out_specs=[
            pl.BlockSpec((block_b, Lq), lambda b: (b, 0)),
            pl.BlockSpec((block_b, E), lambda b: (b, 0)),
            pl.BlockSpec((block_b, La), lambda b: (b, 0)),
            pl.BlockSpec((block_b, E), lambda b: (b, 0)),
        ],
    )

    vmem_est = _vmem_bytes_per_step(block_b, Lq, La, E, in_isz, out_isz)
    vmem_limit = int(min(max(2 * vmem_est, 32 << 20), 64 << 20))

    cost = pl.CostEstimate(
        flops=(2 * B_pad * Lq * E * E            # Q @ U
               + 2 * B_pad * Lq * La * E         # (QU) @ A^T
               + 2 * B_pad * (Lq + La) * E),     # pooled vectors
        transcendentals=B_pad * Lq * La + B_pad * (Lq + La),
        bytes_accessed=(in_isz * (B_pad * (Lq + La) * E + E * E)
                        + out_isz * B_pad * (Lq + La + 2 * E)),
    )

    kernel = functools.partial(_attentive_pooling2_kernel, mxu_dtype=mxu)

    sigq, pvec, siga, cvec = pl.pallas_call(
        kernel,
        out_shape=out_shape,
        grid_spec=grid_spec,
        compiler_params=pltpu.CompilerParams(
            dimension_semantics=("parallel",),
            vmem_limit_bytes=vmem_limit),
        cost_estimate=cost,
    )(protein_p, ligand_p, U)

    # Drop padded batch rows (no reshapes needed: outputs are already 2-D).
    return sigq[:B], pvec[:B], siga[:B], cvec[:B]


def attentive_pooling2_ref(protein, ligand, U):
    """Pure-JAX reference mirroring the PyTorch forward exactly."""
    qu = jnp.einsum('bqe,ef->bqf', protein, U)
    G = jnp.tanh(jnp.einsum('bqf,baf->bqa', qu, ligand))
    g_q = jnp.max(G, axis=2)
    g_a = jnp.max(G, axis=1)

    def score(g, X):
        g = jnp.where(g == 0.0, -1e9, g)
        sigma = jax.nn.softmax(g, axis=-1)
        vec = jnp.sum(X * sigma[:, :, None], axis=1)
        return sigma, vec

    sigma_q, prot_vec = score(g_q, protein)
    sigma_a, chem_vec = score(g_a, ligand)
    return sigma_q, prot_vec, sigma_a, chem_vec


if __name__ == "__main__":
    # Small shapes consistent with the module: batch=2, protein len 16, ligand len 8,
    # embedding_length=128 (lane-aligned small hidden).
    B, LQ, LA, E = 2, 16, 8, 128

    key = jax.random.PRNGKey(0)
    kq, ka, ku = jax.random.split(key, 3)
    protein = jax.random.normal(kq, (B, LQ, E), dtype=jnp.float32)
    ligand = jax.random.normal(ka, (B, LA, E), dtype=jnp.float32)
    # nn.Parameter is zeros in __init__; use a deterministic non-trivial init so the
    # tanh / masked-softmax / pooling path is actually exercised.
    U = 0.05 * jax.random.normal(ku, (E, E), dtype=jnp.float32)

    # f32 path (default): strict parity with the reference.
    sigma_q, prot_vec, sigma_a, chem_vec = attentive_pooling2(protein, ligand, U)
    jax.block_until_ready((sigma_q, prot_vec, sigma_a, chem_vec))

    sq_ref, pv_ref, sa_ref, cv_ref = attentive_pooling2_ref(protein, ligand, U)
    assert sigma_q.shape == (B, LQ) and prot_vec.shape == (B, E)
    assert sigma_a.shape == (B, LA) and chem_vec.shape == (B, E)
    assert jnp.allclose(sigma_q, sq_ref, atol=2e-5, rtol=2e-5)
    assert jnp.allclose(prot_vec, pv_ref, atol=2e-5, rtol=2e-5)
    assert jnp.allclose(sigma_a, sa_ref, atol=2e-5, rtol=2e-5)
    assert jnp.allclose(chem_vec, cv_ref, atol=2e-5, rtol=2e-5)

    # bf16 MXU-operand path (v6e/v7x perf recommendation): sanity check only
    # (matmul operands rounded to bf16, accumulation/elementwise math stays f32).
    sq_b, pv_b, sa_b, cv_b = attentive_pooling2(protein, ligand, U,
                                                mxu_dtype=jnp.bfloat16)
    jax.block_until_ready((sq_b, pv_b, sa_b, cv_b))
    for o, r in ((sq_b, sq_ref), (pv_b, pv_ref), (sa_b, sa_ref), (cv_b, cv_ref)):
        assert jnp.max(jnp.abs(o.astype(jnp.float32) - r)) < 5e-2

    print("KERNEL_OK")
</pallas_src>

<mosaic_0001>
module attributes {stable_mosaic.version = 11 : i64} {
  func.func @_attentive_pooling2_kernel(%arg0: i32, %arg1: memref<8x16x128xf32, #tpu.memory_space<vmem>>, %arg2: memref<8x8x128xf32, #tpu.memory_space<vmem>>, %arg3: memref<128x128xf32, #tpu.memory_space<vmem>>, %arg4: memref<8x16xf32, #tpu.memory_space<vmem>>, %arg5: memref<8x128xf32, #tpu.memory_space<vmem>>, %arg6: memref<8x8xf32, #tpu.memory_space<vmem>>, %arg7: memref<8x128xf32, #tpu.memory_space<vmem>>) attributes {dimension_semantics = [#tpu.dimension_semantics<parallel>], iteration_bounds = array<i64: 1>, scalar_prefetch = 0 : i64, scratch_operands = 0 : i64, tpu.core_type = #tpu.core_type<tc>, window_params = [{transform_indices = @transform_0, window_bounds = array<i64: 8, 16, 128>}, {transform_indices = @transform_1, window_bounds = array<i64: 8, 8, 128>}, {pipeline_mode = #tpu.pipeline_mode<synchronous>, transform_indices = @transform_2, window_bounds = array<i64: 128, 128>}, {transform_indices = @transform_3, window_bounds = array<i64: 8, 16>}, {transform_indices = @transform_4, window_bounds = array<i64: 8, 128>}, {transform_indices = @transform_5, window_bounds = array<i64: 8, 8>}, {transform_indices = @transform_6, window_bounds = array<i64: 8, 128>}]} {
    %c0 = arith.constant 0 : index
    %c0_0 = arith.constant 0 : index
    %c0_1 = arith.constant 0 : index
    %0 = vector.load %arg1[%c0, %c0_0, %c0_1] : memref<8x16x128xf32, #tpu.memory_space<vmem>>, vector<8x16x128xf32>
    %c0_2 = arith.constant 0 : index
    %c0_3 = arith.constant 0 : index
    %c0_4 = arith.constant 0 : index
    %1 = vector.load %arg2[%c0_2, %c0_3, %c0_4] : memref<8x8x128xf32, #tpu.memory_space<vmem>>, vector<8x8x128xf32>
    %c0_5 = arith.constant 0 : index
    %c0_6 = arith.constant 0 : index
    %2 = vector.load %arg3[%c0_5, %c0_6] : memref<128x128xf32, #tpu.memory_space<vmem>>, vector<128x128xf32>
    %3 = vector.shape_cast %0 : vector<8x16x128xf32> to vector<128x128xf32>
    %cst = arith.constant dense<0.000000e+00> : vector<128x128xf32>
    %4 = tpu.matmul %3, %2, %cst {dimension_numbers = #tpu.dot_dimension_numbers<[1], [0], [0], [1], [0, 0, 1, 1], [], []>} : vector<128x128xf32>, vector<128x128xf32>, vector<128x128xf32> -> vector<128x128xf32>
    %5 = vector.shape_cast %4 : vector<128x128xf32> to vector<8x16x128xf32>
    "tpu.trace_start"() <{level = 10 : i32, message = "bqe,bae->bqa"}> : () -> ()
    %cst_7 = arith.constant dense<0.000000e+00> : vector<8x16x8xf32>
    %6 = tpu.matmul %5, %1, %cst_7 {dimension_numbers = #tpu.dot_dimension_numbers<[2], [2], [1], [1], [0, 0, 0, 1, 1, 1], [0], [0]>} : vector<8x16x128xf32>, vector<8x8x128xf32>, vector<8x16x8xf32> -> vector<8x16x8xf32>
    "tpu.trace_stop"() : () -> ()
    %7 = math.tanh %6 : vector<8x16x8xf32>
    %cst_8 = arith.constant dense<0xFF800000> : vector<8x16xf32>
    %8 = vector.multi_reduction <maximumf>, %7, %cst_8 [2] : vector<8x16x8xf32> to vector<8x16xf32>
    %cst_9 = arith.constant dense<0xFF800000> : vector<8x8xf32>
    %9 = vector.multi_reduction <maximumf>, %7, %cst_9 [1] : vector<8x16x8xf32> to vector<8x8xf32>
    %cst_10 = arith.constant 0.000000e+00 : f32
    %10 = vector.broadcast %cst_10 : f32 to vector<8x16xf32>
    %11 = arith.cmpf oeq, %8, %10 : vector<8x16xf32>
    %cst_11 = arith.constant -1.000000e+09 : f32
    %12 = vector.broadcast %cst_11 : f32 to vector<8x16xf32>
    %13 = arith.select %11, %12, %8 : vector<8x16xi1>, vector<8x16xf32>
    %cst_12 = arith.constant dense<0xFF800000> : vector<8xf32>
    %14 = vector.multi_reduction <maximumf>, %13, %cst_12 [1] : vector<8x16xf32> to vector<8xf32>
    %15 = vector.shape_cast %14 : vector<8xf32> to vector<8x1xf32>
    %16 = vector.broadcast %15 : vector<8x1xf32> to vector<8x16xf32>
    %17 = arith.subf %13, %16 : vector<8x16xf32>
    %18 = math.exp %17 : vector<8x16xf32>
    %cst_13 = arith.constant dense<0.000000e+00> : vector<8xf32>
    %19 = vector.multi_reduction <add>, %18, %cst_13 [1] : vector<8x16xf32> to vector<8xf32>
    %20 = vector.shape_cast %19 : vector<8xf32> to vector<8x1xf32>
    %21 = tpu.reciprocal %20 {approx = true} : vector<8x1xf32> -> vector<8x1xf32>
    %22 = arith.mulf %20, %21 : vector<8x1xf32>
    %cst_14 = arith.constant 2.000000e+00 : f32
    %23 = vector.broadcast %cst_14 : f32 to vector<8x1xf32>
    %24 = arith.subf %23, %22 : vector<8x1xf32>
    %25 = arith.mulf %21, %24 : vector<8x1xf32>
    %26 = vector.broadcast %25 : vector<8x1xf32> to vector<8x16xf32>
    %27 = arith.mulf %18, %26 : vector<8x16xf32>
    %cst_15 = arith.constant 0.000000e+00 : f32
    %28 = vector.broadcast %cst_15 : f32 to vector<8x8xf32>
    %29 = arith.cmpf oeq, %9, %28 : vector<8x8xf32>
    %cst_16 = arith.constant -1.000000e+09 : f32
    %30 = vector.broadcast %cst_16 : f32 to vector<8x8xf32>
    %31 = arith.select %29, %30, %9 : vector<8x8xi1>, vector<8x8xf32>
    %cst_17 = arith.constant dense<0xFF800000> : vector<8xf32>
    %32 = vector.multi_reduction <maximumf>, %31, %cst_17 [1] : vector<8x8xf32> to vector<8xf32>
    %33 = vector.shape_cast %32 : vector<8xf32> to vector<8x1xf32>
    %34 = vector.broadcast %33 : vector<8x1xf32> to vector<8x8xf32>
    %35 = arith.subf %31, %34 : vector<8x8xf32>
    %36 = math.exp %35 : vector<8x8xf32>
    %cst_18 = arith.constant dense<0.000000e+00> : vector<8xf32>
    %37 = vector.multi_reduction <add>, %36, %cst_18 [1] : vector<8x8xf32> to vector<8xf32>
    %38 = vector.shape_cast %37 : vector<8xf32> to vector<8x1xf32>
    %39 = tpu.reciprocal %38 {approx = true} : vector<8x1xf32> -> vector<8x1xf32>
    %40 = arith.mulf %38, %39 : vector<8x1xf32>
    %cst_19 = arith.constant 2.000000e+00 : f32
    %41 = vector.broadcast %cst_19 : f32 to vector<8x1xf32>
    %42 = arith.subf %41, %40 : vector<8x1xf32>
    %43 = arith.mulf %39, %42 : vector<8x1xf32>
    %44 = vector.broadcast %43 : vector<8x1xf32> to vector<8x8xf32>
    %45 = arith.mulf %36, %44 : vector<8x8xf32>
    %46 = vector.shape_cast %27 : vector<8x16xf32> to vector<8x16x1xf32>
    %47 = vector.broadcast %46 : vector<8x16x1xf32> to vector<8x16x128xf32>
    %48 = arith.mulf %47, %0 : vector<8x16x128xf32>
    %cst_20 = arith.constant dense<0.000000e+00> : vector<8x128xf32>
    %49 = vector.multi_reduction <add>, %48, %cst_20 [1] : vector<8x16x128xf32> to vector<8x128xf32>
    %50 = vector.shape_cast %45 : vector<8x8xf32> to vector<8x8x1xf32>
    %51 = vector.broadcast %50 : vector<8x8x1xf32> to vector<8x8x128xf32>
    %52 = arith.mulf %51, %1 : vector<8x8x128xf32>
    %cst_21 = arith.constant dense<0.000000e+00> : vector<8x128xf32>
    %53 = vector.multi_reduction <add>, %52, %cst_21 [1] : vector<8x8x128xf32> to vector<8x128xf32>
    %c0_22 = arith.constant 0 : index
    %c0_23 = arith.constant 0 : index
    %54 = vector.load %arg4[%c0_22, %c0_23] : memref<8x16xf32, #tpu.memory_space<vmem>>, vector<8x16xf32>
    tpu.vector_store %arg4[%c0_22, %c0_23], %27 {strides = array<i32>} : memref<8x16xf32, #tpu.memory_space<vmem>>, vector<8x16xf32>,
    %c0_24 = arith.constant 0 : index
    %c0_25 = arith.constant 0 : index
    %55 = vector.load %arg5[%c0_24, %c0_25] : memref<8x128xf32, #tpu.memory_space<vmem>>, vector<8x128xf32>
    tpu.vector_store %arg5[%c0_24, %c0_25], %49 {strides = array<i32>} : memref<8x128xf32, #tpu.memory_space<vmem>>, vector<8x128xf32>,
    %c0_26 = arith.constant 0 : index
    %c0_27 = arith.constant 0 : index
    %56 = vector.load %arg6[%c0_26, %c0_27] : memref<8x8xf32, #tpu.memory_space<vmem>>, vector<8x8xf32>
    tpu.vector_store %arg6[%c0_26, %c0_27], %45 {strides = array<i32>} : memref<8x8xf32, #tpu.memory_space<vmem>>, vector<8x8xf32>,
    %c0_28 = arith.constant 0 : index
    %c0_29 = arith.constant 0 : index
    %57 = vector.load %arg7[%c0_28, %c0_29] : memref<8x128xf32, #tpu.memory_space<vmem>>, vector<8x128xf32>
    tpu.vector_store %arg7[%c0_28, %c0_29], %53 {strides = array<i32>} : memref<8x128xf32, #tpu.memory_space<vmem>>, vector<8x128xf32>,
    return
  }
  func.func @transform_0(%arg0: i32) -> (i32, i32, i32) {
    %c0_i32 = arith.constant 0 : i32
    %c0_i32_0 = arith.constant 0 : i32
    %c0_i32_1 = arith.constant 0 : i32
    return %arg0, %c0_i32, %c0_i32_0 : i32, i32, i32
  }
  func.func @transform_1(%arg0: i32) -> (i32, i32, i32) {
    %c0_i32 = arith.constant 0 : i32
    %c0_i32_0 = arith.constant 0 : i32
    %c0_i32_1 = arith.constant 0 : i32
    return %arg0, %c0_i32, %c0_i32_0 : i32, i32, i32
  }
  func.func @transform_2(%arg0: i32) -> (i32, i32) {
    %c0_i32 = arith.constant 0 : i32
    %c0_i32_0 = arith.constant 0 : i32
    %c0_i32_1 = arith.constant 0 : i32
    return %c0_i32, %c0_i32_0 : i32, i32
  }
  func.func @transform_3(%arg0: i32) -> (i32, i32) {
    %c0_i32 = arith.constant 0 : i32
    %c0_i32_0 = arith.constant 0 : i32
    return %arg0, %c0_i32 : i32, i32
  }
  func.func @transform_4(%arg0: i32) -> (i32, i32) {
    %c0_i32 = arith.constant 0 : i32
    %c0_i32_0 = arith.constant 0 : i32
    return %arg0, %c0_i32 : i32, i32
  }
  func.func @transform_5(%arg0: i32) -> (i32, i32) {
    %c0_i32 = arith.constant 0 : i32
    %c0_i32_0 = arith.constant 0 : i32
    return %arg0, %c0_i32 : i32, i32
  }
  func.func @transform_6(%arg0: i32) -> (i32, i32) {
    %c0_i32 = arith.constant 0 : i32
    %c0_i32_0 = arith.constant 0 : i32
    return %arg0, %c0_i32 : i32, i32
  }
}

</mosaic_0001>

<bundles_post_ra>
// kernel: attentive_pooling2.1
= control target key start
LH: loop header
LB: loop body
LE: loop exit
PB: predicated region body
PF: predicated region fallthrough
CT: control target
= control target key end

     0   :  { %vm2891_vm0 = vcmask 64512   ;;  %vm1048_vm5 = vcmask 1041409   ;;  %vm1050_vm6 = vcmask 1042434   ;;  %vm1052_vm9 = vcmask 1043459   ;;  %s2884_s2 = inlined_call_operand.vmem [shape: f32[128,128], index: 2, kind: input, shape index: {}]   ;;  %s2885_s0 = inlined_call_operand.vmem [shape: f32[8,16,128], index: 0, kind: input, shape index: {}]   ;;  %s2886_s1 = inlined_call_operand.vmem [shape: f32[8,8,128], index: 1, kind: input, shape index: {}]   ;;  %s2887_s5 = inlined_call_operand.vmem [shape: f32[8,8], index: 5, kind: output, shape index: {2}]   ;;  %s2888_s3 = inlined_call_operand.vmem [shape: f32[8,16], index: 3, kind: output, shape index: {0}]   ;;  %s2889_s4 = inlined_call_operand.vmem [shape: f32[8,128], index: 4, kind: output, shape index: {1}]   ;;  %s2890_s6 = inlined_call_operand.vmem [shape: f32[8,128], index: 6, kind: output, shape index: {3}]  }
   0x1   :  { %v57_v0 = vld [vmem:[%s2884_s2 + $0x78] sm:$0xff]  ;;  %v56_v1 = vld [vmem:[%s2884_s2 + $0x70] sm:$0xff]  ;;  %v55_v2 = vld [vmem:[%s2884_s2 + $0x68] sm:$0xff]  ;;  %vm1054_vm10 = vcmask 1044484   ;;  %vm1056_vm12 = vcmask 1045509   ;;  %vm1058_vm13 = vcmask 1046534  }
   0x2   :  { %1968 = vmatprep.subr.mxu0 %v57_v0  ;;  %v54_v3 = vld [vmem:[%s2884_s2 + $0x60] sm:$0xff]  ;;  %v53_v5 = vld [vmem:[%s2884_s2 + $0x58] sm:$0xff]  ;;  %v52_v6 = vld [vmem:[%s2884_s2 + $0x50] sm:$0xff]  ;;  %vm2892_vm14 = vcmask 1047559  }
   0x3   :  { %1969 = vmatpush3.msra.mxu0 %v57_v0  ;;  %v18_v4 = vld [vmem:[%s2885_s0] sm:$0xff]  ;;  %v51_v7 = vld [vmem:[%s2884_s2 + $0x48] sm:$0xff]  ;;  %v49_v10 = vld [vmem:[%s2884_s2 + $0x38] sm:$0xff] }
   0x4   :  { %1970 = vmatprep.subr.mxu0 %v56_v1  ;;  %2000 = vmatprep.mubr.f32.mxu0 %v18_v4  ;;  %v34_v8 = vld [vmem:[%s2886_s1] sm:$0xff]  ;;  %v48_v11 = vld [vmem:[%s2884_s2 + $0x30] sm:$0xff]  ;;  %v47_v12 = vld [vmem:[%s2884_s2 + $0x28] sm:$0xff] }
   0x5   :  { %1971 = vmatpush3.msra.mxu0 %v56_v1  ;;  %2024 = vmatprep.subr.mxu1 %v34_v8  ;;  %v50_v9 = vld [vmem:[%s2884_s2 + $0x40] sm:$0xff]  ;;  %v45_v14 = vld [vmem:[%s2884_s2 + $0x18] sm:$0xff]  ;;  %v44_v15 = vld [vmem:[%s2884_s2 + $0x10] sm:$0xff] }
   0x6   :  { %1972 = vmatprep.subr.mxu0 %v55_v2  ;;  %2025 = vmatpush3.xpose.msra.mxu1 %v34_v8  ;;  %v46_v13 = vld [vmem:[%s2884_s2 + $0x20] sm:$0xff]  ;;  %v43_v16 = vld [vmem:[%s2884_s2 + $0x8] sm:$0xff]  ;;  %v20_v19 = vld [vmem:[%s2885_s0 + $0x10] sm:$0xff] }
   0x7   :  { %1973 = vmatpush3.msra.mxu0 %v55_v2  ;;  %v42_v17 = vld [vmem:[%s2884_s2] sm:$0xff]  ;;  %v19_v18 = vld [vmem:[%s2885_s0 + $0x8] sm:$0xff]  ;;  %v21_v20 = vld [vmem:[%s2885_s0 + $0x18] sm:$0xff] }
   0x8   :  { %1974 = vmatprep.subr.mxu0 %v54_v3  ;;  %v22_v21 = vld [vmem:[%s2885_s0 + $0x20] sm:$0xff]  ;;  %v23_v22 = vld [vmem:[%s2885_s0 + $0x28] sm:$0xff]  ;;  %v24_v23 = vld [vmem:[%s2885_s0 + $0x30] sm:$0xff] }
   0x9   :  { %1975 = vmatpush3.msra.mxu0 %v54_v3  ;;  %v25_v24 = vld [vmem:[%s2885_s0 + $0x38] sm:$0xff]  ;;  %v26_v25 = vld [vmem:[%s2885_s0 + $0x40] sm:$0xff]  ;;  %v27_v26 = vld [vmem:[%s2885_s0 + $0x48] sm:$0xff] }
   0xa   :  { %1976 = vmatprep.subr.mxu0 %v53_v5  ;;  %v28_v27 = vld [vmem:[%s2885_s0 + $0x50] sm:$0xff]  ;;  %v29_v28 = vld [vmem:[%s2885_s0 + $0x58] sm:$0xff]  ;;  %v30_v29 = vld [vmem:[%s2885_s0 + $0x60] sm:$0xff] }
   0xb   :  { %1977 = vmatpush3.msra.mxu0 %v53_v5  ;;  %v31_v30 = vld [vmem:[%s2885_s0 + $0x68] sm:$0xff]  ;;  %v32_v31 = vld [vmem:[%s2885_s0 + $0x70] sm:$0xff]  ;;  %v33_v32 = vld [vmem:[%s2885_s0 + $0x78] sm:$0xff] }
   0xc   :  { %1978 = vmatprep.subr.mxu0 %v52_v6  ;;  %v35_v33 = vld [vmem:[%s2886_s1 + $0x8] sm:$0xff]  ;;  %v36_v36 = vld [vmem:[%s2886_s1 + $0x10] sm:$0xff]  ;;  %v37_v39 = vld [vmem:[%s2886_s1 + $0x18] sm:$0xff] }
   0xd   :  { %1979 = vmatpush3.msra.mxu0 %v52_v6  ;;  %2029 = vmatprep.subr.mxu1 %v35_v33  ;;  %v38_v42 = vld [vmem:[%s2886_s1 + $0x20] sm:$0xff]  ;;  %v39_v45 = vld [vmem:[%s2886_s1 + $0x28] sm:$0xff]  ;;  %v40_v48 = vld [vmem:[%s2886_s1 + $0x30] sm:$0xff] }
   0xe   :  { %1980 = vmatprep.subr.mxu0 %v51_v7  ;;  %v41_v51 = vld [vmem:[%s2886_s1 + $0x38] sm:$0xff] }
   0xf   :  { %1981 = vmatpush3.msra.mxu0 %v51_v7 }
  0x10   :  { %1982 = vmatprep.subr.mxu0 %v50_v9 }
  0x11   :  { %1983 = vmatpush3.msra.mxu0 %v50_v9 }
  0x12   :  { %1984 = vmatprep.subr.mxu0 %v49_v10 }
  0x13   :  { %1985 = vmatpush3.msra.mxu0 %v49_v10 }
  0x14   :  { %1986 = vmatprep.subr.mxu0 %v48_v11 }
  0x15   :  { %1987 = vmatpush3.msra.mxu0 %v48_v11 }
  0x16   :  { %1988 = vmatprep.subr.mxu0 %v47_v12 }
  0x17   :  { %1989 = vmatpush3.msra.mxu0 %v47_v12 }
  0x18   :  { %1990 = vmatprep.subr.mxu0 %v46_v13 }
  0x19   :  { %1991 = vmatpush3.msra.mxu0 %v46_v13 }
  0x1a   :  { %1992 = vmatprep.subr.mxu0 %v45_v14 }
  0x1b   :  { %1993 = vmatpush3.msra.mxu0 %v45_v14 }
  0x1c   :  { %1994 = vmatprep.subr.mxu0 %v44_v15 }
  0x1d   :  { %1995 = vmatpush3.msra.mxu0 %v44_v15 }
  0x1e   :  { %1996 = vmatprep.subr.mxu0 %v43_v16 }
  0x1f   :  { %1997 = vmatpush3.msra.mxu0 %v43_v16 }
  0x20   :  { %1998 = vmatprep.subr.mxu0 %v42_v17 }
  0x21   :  { %1999 = vmatpush3.msra.mxu0 %v42_v17 }
  0x22   :  { %2001 = vmatmul.mubr.f32.vlgmr.msra.gmra.mxu0 %v19_v18 }
  0x23   :  { %2003 = vmatprep.mubr.f32.mxu0 %v20_v19 }
  0x26   :  { %2004 = vmatmul.mubr.f32.gmra.mxu0 %v21_v20 }
  0x27   :  { %2006 = vmatprep.mubr.f32.mxu0 %v22_v21 }
  0x2a   :  { %2007 = vmatmul.mubr.f32.gmra.mxu0 %v23_v22 }
  0x2b   :  { %2009 = vmatprep.mubr.f32.mxu0 %v24_v23 }
  0x2e   :  { %2010 = vmatmul.mubr.f32.gmra.mxu0 %v25_v24 }
  0x2f   :  { %2012 = vmatprep.mubr.f32.mxu0 %v26_v25 }
  0x32   :  { %2013 = vmatmul.mubr.f32.gmra.mxu0 %v27_v26 }
  0x33   :  { %2015 = vmatprep.mubr.f32.mxu0 %v28_v27 }
  0x36   :  { %2016 = vmatmul.mubr.f32.gmra.mxu0 %v29_v28 }
  0x37   :  { %2018 = vmatprep.mubr.f32.mxu0 %v30_v29 }
  0x3a   :  { %2019 = vmatmul.mubr.f32.gmra.mxu0 %v31_v30 }
  0x3b   :  { %2021 = vmatprep.mubr.f32.mxu0 %v32_v31 }
  0x3e   :  { %2022 = vmatmul.mubr.f32.gmra.mxu0 %v33_v32 }
  0xe2   :  { %v2002_v34 = vpop.f32.mrf.mxu0 }
  0xe4   :  { %v124_v35 = vpop.f32.mrf.mxu0 }
  0xe5   :  { %2026 = vmatprep.mubr.f32.mxu1 %v124_v35 }
  0xe6   :  { %v2005_v37 = vpop.f32.mrf.mxu0  ;;  %2027 = vmatmul.mubr.f32.vlgmr.msra.gmra.mxu1 %v2002_v34 }
  0xe7   :  { %2030 = vmatpush3.xpose.msra.mxu1 %v35_v33 }
  0xe8   :  { %v134_v38 = vpop.f32.mrf.mxu0  ;;  %2034 = vmatprep.subr.mxu1 %v36_v36 }
  0xe9   :  { %2031 = vmatprep.mubr.f32.mxu1 %v134_v38 }
  0xea   :  { %v2008_v40 = vpop.f32.mrf.mxu0  ;;  %2032 = vmatmul.mubr.f32.vlgmr.msra.gmra.mxu1 %v2005_v37 }
  0xeb   :  { %2035 = vmatpush3.xpose.msra.mxu1 %v36_v36 }
  0xec   :  { %v144_v41 = vpop.f32.mrf.mxu0  ;;  %2039 = vmatprep.subr.mxu1 %v37_v39 }
  0xed   :  { %2036 = vmatprep.mubr.f32.mxu1 %v144_v41 }
  0xee   :  { %v2011_v43 = vpop.f32.mrf.mxu0  ;;  %2037 = vmatmul.mubr.f32.vlgmr.msra.gmra.mxu1 %v2008_v40 }
  0xef   :  { %2040 = vmatpush3.xpose.msra.mxu1 %v37_v39 }
  0xf0   :  { %v154_v44 = vpop.f32.mrf.mxu0  ;;  %2044 = vmatprep.subr.mxu1 %v38_v42 }
  0xf1   :  { %2041 = vmatprep.mubr.f32.mxu1 %v154_v44 }
  0xf2   :  { %v2014_v46 = vpop.f32.mrf.mxu0  ;;  %2042 = vmatmul.mubr.f32.vlgmr.msra.gmra.mxu1 %v2011_v43 }
  0xf3   :  { %2045 = vmatpush3.xpose.msra.mxu1 %v38_v42 }
  0xf4   :  { %v164_v47 = vpop.f32.mrf.mxu0  ;;  %2049 = vmatprep.subr.mxu1 %v39_v45 }
  0xf5   :  { %2046 = vmatprep.mubr.f32.mxu1 %v164_v47 }
  0xf6   :  { %v2017_v49 = vpop.f32.mrf.mxu0  ;;  %2047 = vmatmul.mubr.f32.vlgmr.msra.gmra.mxu1 %v2014_v46 }
  0xf7   :  { %2050 = vmatpush3.xpose.msra.mxu1 %v39_v45 }
  0xf8   :  { %v174_v50 = vpop.f32.mrf.mxu0  ;;  %2054 = vmatprep.subr.mxu1 %v40_v48 }
  0xf9   :  { %2051 = vmatprep.mubr.f32.mxu1 %v174_v50 }
  0xfa   :  { %v2020_v52 = vpop.f32.mrf.mxu0  ;;  %2052 = vmatmul.mubr.f32.vlgmr.msra.gmra.mxu1 %v2017_v49 }
  0xfb   :  { %2055 = vmatpush3.xpose.msra.mxu1 %v40_v48 }
  0xfc   :  { %v184_v53 = vpop.f32.mrf.mxu0  ;;  %2059 = vmatprep.subr.mxu1 %v41_v51 }
  0xfd   :  { %2056 = vmatprep.mubr.f32.mxu1 %v184_v53 }
  0xfe   :  { %v2023_v54 = vpop.f32.mrf.mxu0  ;;  %2057 = vmatmul.mubr.f32.vlgmr.msra.gmra.mxu1 %v2020_v52 }
  0xff   :  { %2060 = vmatpush3.xpose.msra.mxu1 %v41_v51 }
 0x100   :  { %v194_v55 = vpop.f32.mrf.mxu0 }
 0x101   :  { %2061 = vmatprep.mubr.f32.mxu1 %v194_v55 }
 0x102   :  { %2062 = vmatmul.mubr.f32.vlgmr.msra.gmra.mxu1 %v2023_v54 }
 0x1a6   :  { %v2028_v56 = vpop.f32.mrf.mxu1 }
 0x1a7   :  { %2067 = vtanh.f32 %v2028_v56 }
 0x1a8   :  { %v269_v57 = vpop.f32.mrf.mxu1 }
 0x1a9   :  { %2069 = vtanh.f32 %v269_v57 }
 0x1aa   :  { %v2033_v58 = vpop.f32.mrf.mxu1 }
 0x1ab   :  { %2071 = vtanh.f32 %v2033_v58 }
 0x1ac   :  { %v344_v59 = vpop.f32.mrf.mxu1 }
 0x1ad   :  { %2073 = vtanh.f32 %v344_v59 }
 0x1ae   :  { %v2038_v60 = vpop.f32.mrf.mxu1 }
 0x1af   :  { %2075 = vtanh.f32 %v2038_v60 }
 0x1b0   :  { %v419_v61 = vpop.f32.mrf.mxu1 }
 0x1b1   :  { %2077 = vtanh.f32 %v419_v61 }
 0x1b2   :  { %v2043_v62 = vpop.f32.mrf.mxu1 }
 0x1b3   :  { %2079 = vtanh.f32 %v2043_v62 }
 0x1b4   :  { %v2068_v63 = vpop.eup %2067  ;;  %v494_v0 = vpop.f32.mrf.mxu1 }
 0x1b5   :  { %2081 = vtanh.f32 %v494_v0  ;;  %v823_v1 = vsel %vm2891_vm0, %v2068_v63, -inf }
 0x1b6   :  { %v2070_v2 = vpop.eup %2069  ;;  %824 = vmax.xlane.f32.xlu0 %v823_v1  ;;  %v2048_v3 = vpop.f32.mrf.mxu1 }
 0x1b7   :  { %2083 = vtanh.f32 %v2048_v3  ;;  %v820_v6 = vsel %vm2891_vm0, %v2070_v2, -inf }
 0x1b8   :  { %v2072_v4 = vpop.eup %2071  ;;  %v569_v5 = vpop.f32.mrf.mxu1  ;;  %v868_v15 = vmax.f32 %v820_v6, %v823_v1 }
 0x1b9   :  { %2085 = vtanh.f32 %v569_v5  ;;  %v829_v7 = vsel %vm2891_vm0, %v2072_v4, -inf }
 0x1ba   :  { %v2074_v8 = vpop.eup %2073  ;;  %821 = vmax.xlane.f32.xlu0 %v820_v6  ;;  %830 = vmax.xlane.f32.xlu1 %v829_v7  ;;  %v2053_v9 = vpop.f32.mrf.mxu1  ;;  %v869_v24 = vrot.slane %v868_v15, 4 }
 0x1bb   :  { %v826_v10 = vsel %vm2891_vm0, %v2074_v8, -inf  ;;  %2087 = vtanh.f32 %v2053_v9 }
 0x1bc   :  { %v2076_v11 = vpop.eup %2075  ;;  %v644_v12 = vpop.f32.mrf.mxu1  ;;  %v875_v13 = vmax.f32 %v826_v10, %v829_v7  ;;  %v870_v35 = vmax.f32 %v868_v15, %v869_v24 }
 0x1bd   :  { %2089 = vtanh.f32 %v644_v12  ;;  %v835_v18 = vsel %vm2891_vm0, %v2076_v11, -inf }
 0x1be   :  { %v2078_v14 = vpop.eup %2077  ;;  %827 = vmax.xlane.f32.xlu1 %v826_v10  ;;  %v2058_v16 = vpop.f32.mrf.mxu1  ;;  %v876_v20 = vrot.slane %v875_v13, 4  ;;  %v871_v45 = vrot.slane %v870_v35, 2 }
 0x1bf   :  { %2091 = vtanh.f32 %v2058_v16  ;;  %v832_v17 = vsel %vm2891_vm0, %v2078_v14, -inf }
 0x1c0   :  { %v2080_v19 = vpop.eup %2079  ;;  %833 = vmax.xlane.f32.xlu0 %v832_v17  ;;  %v719_v21 = vpop.f32.mrf.mxu1  ;;  %v882_v22 = vmax.f32 %v832_v17, %v835_v18  ;;  %v877_v30 = vmax.f32 %v875_v13, %v876_v20  ;;  %v872_v56 = vmax.f32 %v870_v35, %v871_v45 }
 0x1c1   :  { %2093 = vtanh.f32 %v719_v21  ;;  %v841_v28 = vsel %vm2891_vm0, %v2080_v19, -inf }
 0x1c2   :  { %v2082_v23 = vpop.eup %2081  ;;  %836 = vmax.xlane.f32.xlu1 %v835_v18  ;;  %v883_v25 = vrot.slane %v882_v22, 4  ;;  %v2063_v26 = vpop.f32.mrf.mxu1  ;;  %v878_v39 = vrot.slane %v877_v30, 2  ;;  %v873_v5 = vrot.slane %v872_v56, 1 }
 0x1c3   :  { %2095 = vtanh.f32 %v2063_v26  ;;  %v838_v27 = vsel %vm2891_vm0, %v2082_v23, -inf }
 0x1c4   :  { %v2084_v29 = vpop.eup %2083  ;;  %839 = vmax.xlane.f32.xlu0 %v838_v27  ;;  %v794_v31 = vpop.f32.mrf.mxu1  ;;  %v889_v32 = vmax.f32 %v838_v27, %v841_v28  ;;  %v884_v33 = vmax.f32 %v882_v22, %v883_v25  ;;  %v879_v50 = vmax.f32 %v877_v30, %v878_v39  ;;  %v874_v17 = vmax.f32 %v872_v56, %v873_v5 }
 0x1c5   :  { %2097 = vtanh.f32 %v794_v31  ;;  %v847_v38 = vsel %vm2891_vm0, %v2084_v29, -inf }
 0x1c6   :  { %v2086_v34 = vpop.eup %2085  ;;  %842 = vmax.xlane.f32.xlu1 %v841_v28  ;;  %v890_v36 = vrot.slane %v889_v32, 4  ;;  %v885_v43 = vrot.slane %v884_v33, 2  ;;  %v880_v63 = vrot.slane %v879_v50, 1  ;;  %vm1364_vm3 = vcmp.eq.f32.partialorder %v874_v17, 0.0 }
 0x1c7   :  { %v844_v37 = vsel %vm2891_vm0, %v2086_v34, -inf }
 0x1c8   :  { %v891_v40 = vmax.f32 %v889_v32, %v890_v36  ;;  %845 = vmax.xlane.f32.xlu0 %v844_v37  ;;  %v896_v41 = vmax.f32 %v844_v37, %v847_v38  ;;  %v2088_v42 = vpop.eup %2087  ;;  %v886_v53 = vmax.f32 %v884_v33, %v885_v43  ;;  %v881_v12 = vmax.f32 %v879_v50, %v880_v63 }
 0x1c9   :  { %v853_v52 = vsel %vm2891_vm0, %v2088_v42, -inf  ;;  %v2351_v32 = vsel %vm1364_vm3, -1e+09, %v874_v17 }
 0x1ca   :  { %v2090_v44 = vpop.eup %2089  ;;  %v892_v46 = vrot.slane %v891_v40, 2  ;;  %848 = vmax.xlane.f32.xlu1 %v847_v38  ;;  %v897_v47 = vrot.slane %v896_v41, 4  ;;  %v887_v2 = vrot.slane %v886_v53, 1  ;;  %vm1365_vm1 = vcmp.eq.f32.partialorder %v881_v12, 0.0 }
 0x1cb   :  { %v850_v48 = vsel %vm2891_vm0, %v2090_v44, -inf  ;;  %v2347_v28 = vsel %vm1365_vm1, -1e+09, %v881_v12 }
 0x1cc   :  { %v2092_v49 = vpop.eup %2091  ;;  %v898_v51 = vmax.f32 %v896_v41, %v897_v47  ;;  %851 = vmax.xlane.f32.xlu0 %v850_v48  ;;  %v903_v54 = vmax.f32 %v850_v48, %v853_v52  ;;  %v893_v57 = vmax.f32 %v891_v40, %v892_v46  ;;  %v888_v15 = vmax.f32 %v886_v53, %v887_v2 }
 0x1cd   :  { %v859_v61 = vsel %vm2891_vm0, %v2092_v49, -inf  ;;  %v1388_v34 = vsel %vm1048_vm5, %v2347_v28, %v2351_v32 }
 0x1ce   :  { %v2094_v55 = vpop.eup %2093  ;;  %v899_v58 = vrot.slane %v898_v51, 2  ;;  %854 = vmax.xlane.f32.xlu1 %v853_v52  ;;  %v904_v59 = vrot.slane %v903_v54, 4  ;;  %v894_v6 = vrot.slane %v893_v57, 1  ;;  %vm1366_vm2 = vcmp.eq.f32.partialorder %v888_v15, 0.0 }
 0x1cf   :  { %v856_v60 = vsel %vm2891_vm0, %v2094_v55, -inf  ;;  %v2349_v29 = vsel %vm1366_vm2, -1e+09, %v888_v15  ;;  %v972_v52 = vlaneseq }
 0x1d0   :  { %v2096_v62 = vpop.eup %2095  ;;  %v900_v0 = vmax.f32 %v898_v51, %v899_v58  ;;  %857 = vmax.xlane.f32.xlu0 %v856_v60  ;;  %v910_v1 = vmax.f32 %v856_v60, %v859_v61  ;;  %v905_v3 = vmax.f32 %v903_v54, %v904_v59  ;;  %v895_v18 = vmax.f32 %v893_v57, %v894_v6 }
 0x1d1   :  { %v865_v11 = vsel %vm2891_vm0, %v2096_v62, -inf  ;;  %v1389_v37 = vsel %vm1050_vm6, %v2349_v29, %v1388_v34  ;;  %v973_v55 = vand.u32 127, %v972_v52  ;;  %v2379_v58 = vshrl.u32 %v972_v52, 7 }
 0x1d2   :  { %v2098_v4 = vpop.eup %2097  ;;  %860 = vmax.xlane.f32.xlu1 %v859_v61  ;;  %v911_v7 = vrot.slane %v910_v1, 4  ;;  %v901_v8 = vrot.slane %v900_v0, 1  ;;  %v906_v9 = vrot.slane %v905_v3, 2  ;;  %vm1367_vm4 = vcmp.eq.f32.partialorder %v895_v18, 0.0 }
 0x1d3   :  { %v862_v10 = vsel %vm2891_vm0, %v2098_v4, -inf  ;;  %v2353_v33 = vsel %vm1367_vm4, -1e+09, %v895_v18  ;;  %v978_v59 = vadd.s32 4294967288, %v973_v55  ;;  %v2382_v61 = vsub.s32 %v973_v55, %v2379_v58 }
 0x1d4   :  { %v912_v13 = vmax.f32 %v910_v1, %v911_v7  ;;  %863 = vmax.xlane.f32.xlu0 %v862_v10  ;;  %v917_v14 = vmax.f32 %v862_v10, %v865_v11  ;;  %v907_v16 = vmax.f32 %v905_v3, %v906_v9  ;;  %v902_v21 = vmax.f32 %v900_v0, %v901_v8 }
 0x1d5   :  { %v1390_v41 = vsel %vm1052_vm9, %v2353_v33, %v1389_v37  ;;  %v2389_v1 = vsub.s32 %v978_v59, %v2379_v58 }
 0x1d6   :  { %v913_v19 = vrot.slane %v912_v13, 2  ;;  %866 = vmax.xlane.f32.xlu1 %v865_v11  ;;  %v918_v20 = vrot.slane %v917_v14, 4  ;;  %v908_v22 = vrot.slane %v907_v16, 1  ;;  %vm1368_vm7 = vcmp.eq.f32.partialorder %v902_v21, 0.0 }
 0x1d7   :  { %v2358_v35 = vsel %vm1368_vm7, -1e+09, %v902_v21 }
 0x1d8   :  { %v914_v23 = vmax.f32 %v912_v13, %v913_v19  ;;  %v919_v24 = vmax.f32 %v917_v14, %v918_v20  ;;  %v909_v25 = vmax.f32 %v907_v16, %v908_v22  ;;  %v1391_v42 = vsel %vm1054_vm10, %v2358_v35, %v1390_v41 }
 0x1da   :  { %v915_v26 = vrot.slane %v914_v23, 1  ;;  %v920_v27 = vrot.slane %v919_v24, 2  ;;  %vm1369_vm8 = vcmp.eq.f32.partialorder %v909_v25, 0.0 }
 0x1db   :  { %v2362_v38 = vsel %vm1369_vm8, -1e+09, %v909_v25 }
 0x1dc   :  { %v916_v30 = vmax.f32 %v914_v23, %v915_v26  ;;  %v921_v31 = vmax.f32 %v919_v24, %v920_v27  ;;  %v1392_v43 = vsel %vm1056_vm12, %v2362_v38, %v1391_v42 }
 0x1de   :  { %v922_v36 = vrot.slane %v921_v31, 1  ;;  %vm1370_vm11 = vcmp.eq.f32.partialorder %v916_v30, 0.0 }
 0x1df   :  { %v2364_v40 = vsel %vm1370_vm11, -1e+09, %v916_v30 }
 0x1e0   :  { %v923_v39 = vmax.f32 %v921_v31, %v922_v36  ;;  %v1393_v45 = vsel %vm1058_vm13, %v2364_v40, %v1392_v43 }
 0x1e2   :  { %vm1371_vm15 = vcmp.eq.f32.partialorder %v923_v39, 0.0 }
 0x1e3   :  { %v2372_v44 = vsel %vm1371_vm15, -1e+09, %v923_v39 }
 0x1e4   :  { %v1394_v46 = vsel %vm2892_vm14, %v2372_v44, %v1393_v45 }
 0x1e5   :  { %v1396_v47 = vsel %vm2891_vm0, %v1394_v46, -inf  ;;  %vm983_vm0 = vcmask 130112  }
 0x1e6   :  { %1397 = vmax.xlane.f32.xlu1 %v1396_v47 }
 0x23f   :  { %v825_v48 = vpop.xlane.xlu0 %824 }
 0x240   :  { %vm925_vm3 = vcmp.eq.f32.partialorder %v825_v48, 0.0 }
 0x241   :  { %v2391_v2 = vsel %vm925_vm3, -1e+09, %v825_v48 }
 0x242   :  { %v982_v17 = vrot.slane %v2391_v2, %v2389_v1 }
 0x243   :  { %v831_v49 = vpop.xlane.xlu1 %830  ;;  %v822_v50 = vpop.xlane.xlu0 %821 }
 0x244   :  { %vm924_vm1 = vcmp.eq.f32.partialorder %v822_v50, 0.0  ;;  %vm927_vm4 = vcmp.eq.f32.partialorder %v831_v49, 0.0 }
 0x245   :  { %v2384_v63 = vsel %vm924_vm1, -1e+09, %v822_v50  ;;  %v2393_v4 = vsel %vm927_vm4, -1e+09, %v831_v49 }
 0x246   :  { %v977_v6 = vrot.slane %v2384_v63, %v2382_v61  ;;  %v992_v12 = vrot.slane %v2393_v4, %v2389_v1 }
 0x247   :  { %v828_v51 = vpop.xlane.xlu1 %827 }
 0x248   :  { %vm926_vm2 = vcmp.eq.f32.partialorder %v828_v51, 0.0  ;;  %v984_v30 = vsel %vm983_vm0, %v982_v17, %v977_v6  ;;  %v2175_v6 = vmov 0  }
 0x249   :  { %v834_v53 = vpop.xlane.xlu0 %833  ;;  %v2386_v0 = vsel %vm926_vm2, -1e+09, %v828_v51  ;;  %2066 = vset.pattern.permute.xlu1 %v2175_v6  ;;  %2065 = vset.pattern.permute.xlu0 %v2175_v6 }
 0x24a   :  { %vm928_vm11 = vcmp.eq.f32.partialorder %v834_v53, 0.0  ;;  %v988_v7 = vrot.slane %v2386_v0, %v2382_v61 }
 0x24b   :  { %v837_v54 = vpop.xlane.xlu1 %836  ;;  %v2403_v10 = vsel %vm928_vm11, -1e+09, %v834_v53  ;;  %vm1063_vm11 = vcmask 130048  }
 0x24c   :  { %vm929_vm7 = vcmp.eq.f32.partialorder %v837_v54, 0.0  ;;  %v993_v20 = vsel %vm983_vm0, %v992_v12, %v988_v7  ;;  %v997_v21 = vrot.slane %v2403_v10, %v2382_v61  ;;  %v2468_v7 = vsub.s32 0, %v2379_v58 }
 0x24d   :  { %v840_v56 = vpop.xlane.xlu0 %839  ;;  %v2395_v5 = vsel %vm929_vm7, -1e+09, %v837_v54  ;;  %v1049_v43 = vsel %vm1048_vm5, %v993_v20, %v984_v30 }
 0x24e   :  { %vm930_vm14 = vcmp.eq.f32.partialorder %v840_v56, 0.0  ;;  %v1001_v13 = vrot.slane %v2395_v5, %v2389_v1 }
 0x24f   :  { %v843_v57 = vpop.xlane.xlu1 %842  ;;  %v2411_v14 = vsel %vm930_vm14, -1e+09, %v840_v56 }
 0x250   :  { %vm931_vm8 = vcmp.eq.f32.partialorder %v843_v57, 0.0  ;;  %v1006_v25 = vrot.slane %v2411_v14, %v2382_v61  ;;  %v1002_v31 = vsel %vm983_vm0, %v1001_v13, %v997_v21  ;;  %v1078_v21 = vsub.s32 2, %v2379_v58 }
 0x251   :  { %v846_v60 = vpop.xlane.xlu0 %845  ;;  %v2401_v8 = vsel %vm931_vm8, -1e+09, %v843_v57  ;;  %v1051_v49 = vsel %vm1050_vm6, %v1002_v31, %v1049_v43  ;;  %v1094_v31 = vsub.s32 6, %v2379_v58 }
 0x252   :  { %vm932_vm1 = vcmp.eq.f32.partialorder %v846_v60, 0.0  ;;  %v1010_v18 = vrot.slane %v2401_v8, %v2389_v1 }
 0x253   :  { %v849_v62 = vpop.xlane.xlu1 %848  ;;  %v2419_v19 = vsel %vm932_vm1, -1e+09, %v846_v60 }
 0x254   :  { %vm933_vm15 = vcmp.eq.f32.partialorder %v849_v62, 0.0  ;;  %v1015_v34 = vrot.slane %v2419_v19, %v2382_v61  ;;  %v1011_v39 = vsel %vm983_vm0, %v1010_v18, %v1006_v25 }
 0x255   :  { %v852_v3 = vpop.xlane.xlu0 %851  ;;  %v2405_v11 = vsel %vm933_vm15, -1e+09, %v849_v62  ;;  %v1053_v51 = vsel %vm1052_vm9, %v1011_v39, %v1051_v49  ;;  %vm2893_vm15 = vcmask 1047559  }
 0x256   :  { %vm934_vm2 = vcmp.eq.f32.partialorder %v852_v3, 0.0  ;;  %v1019_v22 = vrot.slane %v2405_v11, %v2389_v1  ;;  %vm2894_vm1 = vmmov %vm2893_vm15 }
 0x257   :  { %v855_v9 = vpop.xlane.xlu1 %854  ;;  %v2426_v23 = vsel %vm934_vm2, -1e+09, %v852_v3  ;;  %vm2895_vm2 = vcmask 64512  }
 0x258   :  { %vm935_vm3 = vcmp.eq.f32.partialorder %v855_v9, 0.0  ;;  %v1024_v41 = vrot.slane %v2426_v23, %v2382_v61  ;;  %v1020_v45 = vsel %vm983_vm0, %v1019_v22, %v1015_v34  ;;  %v1090_v22 = vsub.s32 5, %v2379_v58 }
 0x259   :  { %v2413_v15 = vsel %vm935_vm3, -1e+09, %v855_v9  ;;  %v858_v16 = vpop.xlane.xlu0 %857  ;;  %v1055_v56 = vsel %vm1054_vm10, %v1020_v45, %v1053_v51  ;;  %v1074_v9 = vsub.s32 1, %v2379_v58  ;;  %vm2896_vm3 = vmmov %vm2894_vm1 }
 0x25a   :  { %vm936_vm4 = vcmp.eq.f32.partialorder %v858_v16, 0.0  ;;  %v1028_v26 = vrot.slane %v2413_v15, %v2389_v1 }
 0x25b   :  { %v861_v24 = vpop.xlane.xlu1 %860  ;;  %v2432_v27 = vsel %vm936_vm4, -1e+09, %v858_v16  ;;  %v1086_v16 = vsub.s32 4, %v2379_v58  ;;  %vm2897_vm4 = vmmov %vm2894_vm1 }
 0x25c   :  { %vm937_vm14 = vcmp.eq.f32.partialorder %v861_v24, 0.0  ;;  %v1033_v46 = vrot.slane %v2432_v27, %v2382_v61  ;;  %v1029_v50 = vsel %vm983_vm0, %v1028_v26, %v1024_v41  ;;  %v1098_v41 = vsub.s32 7, %v2379_v58 }
 0x25d   :  { %v2438_v36 = vsel %vm937_vm14, -1e+09, %v861_v24  ;;  %v864_v37 = vpop.xlane.xlu0 %863  ;;  %v1057_v57 = vsel %vm1056_vm12, %v1029_v50, %v1055_v56  ;;  %vm2898_vm14 = vmmov %vm2895_vm2 }
 0x25e   :  { %v1037_v42 = vrot.slane %v2438_v36, %v2389_v1  ;;  %vm938_vm7 = vcmp.eq.f32.partialorder %v864_v37, 0.0 }
 0x25f   :  { %v2449_v47 = vsel %vm938_vm7, -1e+09, %v864_v37  ;;  %v867_v48 = vpop.xlane.xlu1 %866  ;;  %vm2899_vm7 = vmmov %vm2894_vm1 }
 0x260   :  { %vm939_vm8 = vcmp.eq.f32.partialorder %v867_v48, 0.0  ;;  %v1038_v53 = vsel %vm983_vm0, %v1037_v42, %v1033_v46  ;;  %v1042_v54 = vrot.slane %v2449_v47, %v2382_v61 }
 0x261   :  { %v2454_v52 = vsel %vm939_vm8, -1e+09, %v867_v48  ;;  %v1059_v60 = vsel %vm1058_vm13, %v1038_v53, %v1057_v57 }
 0x262   :  { %v1046_v55 = vrot.slane %v2454_v52, %v2389_v1 }
 0x264   :  { %v1047_v59 = vsel %vm983_vm0, %v1046_v55, %v1042_v54 }
 0x265   :  { %v1061_v62 = vsel %vm2893_vm15, %v1047_v59, %v1059_v60 }
 0x266   :  { %v1064_v3 = vsel %vm1063_vm11, %v1061_v62, -inf }
 0x267   :  { %1065 = vmax.xlane.f32.xlu0 %v1064_v3 }
 0x26f   :  { %v2506_v50 = vpop.xlane.xlu1 %1397 }
 0x270   :  { %v1400_v53 = vrot.slane %v2506_v50, 1 }
 0x272   :  { %v1416_v60 = vsub.f32 %v2347_v28, %v1400_v53 }
 0x2f0   :  { %v1066_v12 = vpop.xlane.xlu0 %1065 }
 0x2f1   :  { %v1071_v13 = vrot.slane %v1066_v12, %v2468_v7  ;;  %v1075_v17 = vrot.slane %v1066_v12, %v1074_v9  ;;  %v2481_v24 = vrot.slane %v1066_v12, %v1086_v16  ;;  %v1079_v34 = vrot.slane %v1066_v12, %v1078_v21 }
 0x2f3   :  { %v1108_v18 = vsub.f32 %v2384_v63, %v1071_v13  ;;  %v1109_v20 = vsub.f32 %v2391_v2, %v1071_v13  ;;  %v1110_v25 = vsub.f32 %v2386_v0, %v1075_v17  ;;  %v1111_v63 = vsub.f32 %v2393_v4, %v1075_v17 }
 0x2f4   :  { %v2490_v2 = vrot.slane %v1066_v12, %v1090_v22  ;;  %v1117_v37 = vsub.f32 %v2405_v11, %v2481_v24  ;;  %v1082_v0 = vsub.s32 3, %v2379_v58  ;;  %v1112_v42 = vsub.f32 %v2403_v10, %v1079_v34 }
 0x2f5   :  { %v1124_v26 = vmul.f32 1.442695, %v1108_v18  ;;  %v1126_v30 = vmul.f32 1.442695, %v1109_v20  ;;  %v1128_v39 = vmul.f32 1.442695, %v1110_v25  ;;  %v2499_v4 = vrot.slane %v1066_v12, %v1094_v31 }
 0x2f6   :  { %v1130_v43 = vmul.f32 1.442695, %v1111_v63  ;;  %v1119_v45 = vsub.f32 %v2413_v15, %v2490_v2  ;;  %v1142_v46 = vmul.f32 1.442695, %v1117_v37  ;;  %v1083_v11 = vrot.slane %v1066_v12, %v1082_v0 }
 0x2f7   :  { %2099 = vpow2.f32 %v1124_v26  ;;  %v1113_v48 = vsub.f32 %v2395_v5, %v1079_v34  ;;  %v1132_v49 = vmul.f32 1.442695, %v1112_v42  ;;  %v2510_v10 = vrot.slane %v1066_v12, %v1098_v41 }
 0x2f8   :  { %2101 = vpow2.f32 %v1126_v30  ;;  %v1121_v51 = vsub.f32 %v2438_v36, %v2499_v4  ;;  %v1146_v15 = vmul.f32 1.442695, %v1119_v45  ;;  %v1114_v54 = vsub.f32 %v2411_v14, %v1083_v11 }
 0x2f9   :  { %2103 = vpow2.f32 %v1128_v39  ;;  %v1134_v55 = vmul.f32 1.442695, %v1113_v48  ;;  %v1123_v56 = vsub.f32 %v2454_v52, %v2510_v10  ;;  %v1401_v36 = vrot.slane %v2506_v50, 2 }
 0x2fa   :  { %2105 = vpow2.f32 %v1130_v43  ;;  %v1150_v57 = vmul.f32 1.442695, %v1121_v51  ;;  %v1136_v14 = vmul.f32 1.442695, %v1114_v54  ;;  %v1115_v62 = vsub.f32 %v2401_v8, %v1083_v11 }
 0x2fb   :  { %2107 = vpow2.f32 %v1142_v46  ;;  %v1154_v3 = vmul.f32 1.442695, %v1123_v56  ;;  %v1417_v52 = vsub.f32 %v2349_v29, %v1401_v36  ;;  %v1402_v12 = vrot.slane %v2506_v50, 3 }
 0x2fc   :  { %2109 = vpow2.f32 %v1132_v49  ;;  %v1425_v13 = vmul.f32 1.442695, %v1416_v60  ;;  %v1116_v28 = vsub.f32 %v2419_v19, %v2481_v24  ;;  %v1138_v18 = vmul.f32 1.442695, %v1115_v62 }
 0x2fd   :  { %2111 = vpow2.f32 %v1146_v15  ;;  %v1415_v20 = vsub.f32 %v2351_v32, %v2506_v50  ;;  %v1403_v29 = vrot.slane %v2506_v50, 4  ;;  %v1427_v25 = vmul.f32 1.442695, %v1417_v52 }
 0x2fe   :  { %2113 = vpow2.f32 %v1134_v55  ;;  %v1418_v26 = vsub.f32 %v2353_v33, %v1402_v12  ;;  %v1118_v19 = vsub.f32 %v2426_v23, %v2490_v2  ;;  %v1140_v24 = vmul.f32 1.442695, %v1116_v28 }
 0x2ff   :  { %2115 = vpow2.f32 %v1150_v57  ;;  %v1404_v32 = vrot.slane %v2506_v50, 5  ;;  %v1423_v63 = vmul.f32 1.442695, %v1415_v20  ;;  %v1419_v37 = vsub.f32 %v2358_v35, %v1403_v29 }
 0x300   :  { %2117 = vpow2.f32 %v1136_v14  ;;  %v1405_v33 = vrot.slane %v2506_v50, 6  ;;  %v1429_v39 = vmul.f32 1.442695, %v1418_v26  ;;  %v1120_v23 = vsub.f32 %v2432_v27, %v2499_v4 }
 0x301   :  { %2119 = vpow2.f32 %v1154_v3  ;;  %v1144_v2 = vmul.f32 1.442695, %v1118_v19  ;;  %v1420_v45 = vsub.f32 %v2362_v38, %v1404_v32  ;;  %v1431_v35 = vmul.f32 1.442695, %v1419_v37 }
 0x302   :  { %2121 = vpow2.f32 %v1425_v13  ;;  %v1406_v46 = vrot.slane %v2506_v50, 7  ;;  %v1421_v11 = vsub.f32 %v2364_v40, %v1405_v33  ;;  %v1122_v27 = vsub.f32 %v2449_v47, %v2510_v10 }
 0x303   :  { %2123 = vpow2.f32 %v1138_v18  ;;  %v1148_v4 = vmul.f32 1.442695, %v1120_v23  ;;  %v1433_v38 = vmul.f32 1.442695, %v1420_v45 }
 0x304   :  { %v2516_v5 = vpop.eup %2099  ;;  %2125 = vpow2.f32 %v1427_v25  ;;  %v1435_v51 = vmul.f32 1.442695, %v1421_v11  ;;  %v1422_v50 = vsub.f32 %v2372_v44, %v1406_v46  ;;  %v1152_v15 = vmul.f32 1.442695, %v1122_v27 }
 0x305   :  { %v2520_v59 = vpop.eup %2101  ;;  %1173 = vperm.xlu0 %2065, %v2516_v5   ;;  %2127 = vpow2.f32 %v1140_v24 }
 0x306   :  { %1176 = vperm.xlu1 %2066, %v2520_v59   ;;  %v2527_v6 = vpop.eup %2103  ;;  %2129 = vpow2.f32 %v1423_v63  ;;  %v1437_v10 = vmul.f32 1.442695, %v1422_v50 }
 0x307   :  { %v2532_v17 = vpop.eup %2105  ;;  %2131 = vpow2.f32 %v1429_v39 }
 0x308   :  { %v2536_v8 = vpop.eup %2107  ;;  %2133 = vpow2.f32 %v1144_v2 }
 0x309   :  { %1200 = vperm.xlu0 %2065, %v2536_v8   ;;  %v2544_v30 = vpop.eup %2109  ;;  %2135 = vpow2.f32 %v1431_v35 }
 0x30a   :  { %1179 = vperm.xlu1 %2066, %v2527_v6   ;;  %v2548_v34 = vpop.eup %2111  ;;  %2137 = vpow2.f32 %v1148_v4 }
 0x30b   :  { %v2555_v42 = vpop.eup %2113  ;;  %2139 = vpow2.f32 %v1433_v38 }
 0x30c   :  { %v2559_v43 = vpop.eup %2115  ;;  %2141 = vpow2.f32 %v1435_v51 }
 0x30d   :  { %1206 = vperm.xlu0 %2065, %v2548_v34   ;;  %v2566_v48 = vpop.eup %2117  ;;  %2143 = vpow2.f32 %v1152_v15 }
 0x30e   :  { %1182 = vperm.xlu1 %2066, %v2532_v17   ;;  %v2570_v49 = vpop.eup %2119  ;;  %2145 = vpow2.f32 %v1437_v10 }
 0x30f   :  { %v2575_v40 = vpop.eup %2121 }
 0x310   :  { %v2577_v53 = vpop.eup %2123  ;;  %v1447_v54 = vrot.slane %v2575_v40, 7 }
 0x311   :  { %1212 = vperm.xlu0 %2065, %v2559_v43   ;;  %v2580_v47 = vpop.eup %2125 }
 0x312   :  { %1185 = vperm.xlu1 %2066, %v2544_v30   ;;  %v2583_v55 = vpop.eup %2127  ;;  %v1449_v44 = vrot.slane %v2580_v47, 6 }
 0x313   :  { %v2585_v56 = vpop.eup %2129 }
 0x314   :  { %v1448_v57 = vsel %vm1048_vm5, %v1447_v54, %v2585_v56  ;;  %v2591_v36 = vpop.eup %2131 }
 0x315   :  { %1218 = vperm.xlu0 %2065, %v2570_v49   ;;  %v2593_v60 = vpop.eup %2133  ;;  %v1450_v14 = vsel %vm1050_vm6, %v1449_v44, %v1448_v57  ;;  %v1451_v3 = vrot.slane %v2591_v36, 5 }
 0x316   :  { %1188 = vperm.xlu1 %2066, %v2555_v42   ;;  %v2597_v62 = vpop.eup %2135 }
 0x317   :  { %v2600_v52 = vpop.eup %2137  ;;  %v1452_v12 = vsel %vm1052_vm9, %v1451_v3, %v1450_v14  ;;  %v1453_v28 = vrot.slane %v2597_v62, 4 }
 0x318   :  { %v2603_v13 = vpop.eup %2139 }
 0x319   :  { %v2607_v18 = vpop.eup %2141  ;;  %v1454_v20 = vsel %vm1054_vm10, %v1453_v28, %v1452_v12  ;;  %v1455_v25 = vrot.slane %v2603_v13, 3 }
 0x31a   :  { %1191 = vperm.xlu1 %2066, %v2566_v48   ;;  %v2610_v29 = vpop.eup %2143  ;;  %v1457_v24 = vrot.slane %v2607_v18, 2 }
 0x31b   :  { %v1456_v26 = vsel %vm1056_vm12, %v1455_v25, %v1454_v20  ;;  %v2615_v19 = vpop.eup %2145 }
 0x31c   :  { %v1458_v32 = vsel %vm1058_vm13, %v1457_v24, %v1456_v26  ;;  %v1459_v63 = vrot.slane %v2615_v19, 1 }
 0x31e   :  { %1194 = vperm.xlu1 %2066, %v2577_v53   ;;  %v1460_v37 = vsel %vm2894_vm1, %v1459_v63, %v1458_v32 }
 0x31f   :  { %v1462_v33 = vsel %vm2895_vm2, %v1460_v37, 0.0 }
 0x322   :  { %1197 = vperm.xlu1 %2066, %v2583_v55  }
 0x326   :  { %1203 = vperm.xlu1 %2066, %v2593_v60  }
 0x32a   :  { %1209 = vperm.xlu1 %2066, %v2600_v52  }
 0x32e   :  { %1215 = vperm.xlu1 %2066, %v2610_v29  }
 0x334   :  { %1463 = vadd.xlane.f32.xlu0 %v1462_v33 }
 0x380   :  { %v1174_v35 = vpop.permute.xlu0 %1173 }
 0x381   :  { %v1177_v39 = vpop.permute.xlu1 %1176  ;;  %v1223_v44 = vrot.slane %v1174_v35, %v2382_v61 }
 0x382   :  { %v1227_v57 = vrot.slane %v1177_v39, %v2389_v1 }
 0x384   :  { %v1201_v11 = vpop.permute.xlu0 %1200  ;;  %v1228_v37 = vsel %vm983_vm0, %v1227_v57, %v1223_v44 }
 0x385   :  { %v1180_v23 = vpop.permute.xlu1 %1179  ;;  %v1263_v24 = vrot.slane %v1201_v11, %v2389_v1 }
 0x386   :  { %v1232_v14 = vrot.slane %v1180_v23, %v2382_v61 }
 0x388   :  { %v1207_v38 = vpop.permute.xlu0 %1206 }
 0x389   :  { %v1183_v2 = vpop.permute.xlu1 %1182  ;;  %v1272_v33 = vrot.slane %v1207_v38, %v2389_v1 }
 0x38a   :  { %v1236_v50 = vrot.slane %v1183_v2, %v2389_v1 }
 0x38c   :  { %v1213_v15 = vpop.permute.xlu0 %1212  ;;  %v1237_v20 = vsel %vm983_vm0, %v1236_v50, %v1232_v14 }
 0x38d   :  { %v1186_v45 = vpop.permute.xlu1 %1185  ;;  %v1292_v2 = vsel %vm1048_vm5, %v1237_v20, %v1228_v37 }
 0x38e   :  { %v1241_v12 = vrot.slane %v1186_v45, %v2382_v61  ;;  %v1281_v45 = vrot.slane %v1213_v15, %v2389_v1 }
 0x390   :  { %v1219_v35 = vpop.permute.xlu0 %1218 }
 0x391   :  { %v1189_v46 = vpop.permute.xlu1 %1188  ;;  %v1290_v50 = vrot.slane %v1219_v35, %v2389_v1 }
 0x392   :  { %v1245_v10 = vrot.slane %v1189_v46, %v2389_v1 }
 0x394   :  { %v1246_v32 = vsel %vm983_vm0, %v1245_v10, %v1241_v12 }
 0x395   :  { %v1192_v27 = vpop.permute.xlu1 %1191  ;;  %v1293_v11 = vsel %vm1050_vm6, %v1246_v32, %v1292_v2 }
 0x396   :  { %v1250_v25 = vrot.slane %v1192_v27, %v2382_v61 }
 0x399   :  { %v1195_v4 = vpop.permute.xlu1 %1194 }
 0x39a   :  { %v1254_v3 = vrot.slane %v1195_v4, %v2389_v1 }
 0x39c   :  { %v1255_v39 = vsel %vm983_vm0, %v1254_v3, %v1250_v25 }
 0x39d   :  { %v1198_v51 = vpop.permute.xlu1 %1197  ;;  %v1294_v4 = vsel %vm1052_vm9, %v1255_v39, %v1293_v11 }
 0x39e   :  { %v1259_v28 = vrot.slane %v1198_v51, %v2382_v61 }
 0x3a0   :  { %v1264_v46 = vsel %vm983_vm0, %v1263_v24, %v1259_v28 }
 0x3a1   :  { %v1204_v54 = vpop.permute.xlu1 %1203  ;;  %v1295_v10 = vsel %vm1054_vm10, %v1264_v46, %v1294_v4 }
 0x3a2   :  { %v1268_v26 = vrot.slane %v1204_v54, %v2382_v61 }
 0x3a4   :  { %v1273_v27 = vsel %vm983_vm0, %v1272_v33, %v1268_v26 }
 0x3a5   :  { %v1210_v63 = vpop.permute.xlu1 %1209  ;;  %v1296_v15 = vsel %vm1056_vm12, %v1273_v27, %v1295_v10 }
 0x3a6   :  { %v1277_v23 = vrot.slane %v1210_v63, %v2382_v61 }
 0x3a8   :  { %v1282_v51 = vsel %vm983_vm0, %v1281_v45, %v1277_v23 }
 0x3a9   :  { %v1216_v38 = vpop.permute.xlu1 %1215  ;;  %v1297_v57 = vsel %vm1058_vm13, %v1282_v51, %v1296_v15 }
 0x3aa   :  { %v1286_v54 = vrot.slane %v1216_v38, %v2382_v61 }
 0x3ac   :  { %v1291_v44 = vsel %vm983_vm0, %v1290_v50, %v1286_v54 }
 0x3ad   :  { %v1298_v14 = vsel %vm2896_vm3, %v1291_v44, %v1297_v57 }
 0x3ae   :  { %v1300_v3 = vsel %vm1063_vm11, %v1298_v14, 0.0 }
 0x3af   :  { %1301 = vadd.xlane.f32.xlu1 %v1300_v3 }
 0x3bd   :  { %v1464_v12 = vpop.xlane.xlu0 %1463 }
 0x3be   :  { %2147 = vrcp.f32 %v1464_v12 }
 0x3cb   :  { %v2148_v28 = vpop.eup %2147 }
 0x3cc   :  { %v1466_v20 = vmul.f32 %v2148_v28, %v1464_v12 }
 0x3ce   :  { %v1467_v25 = vsub.f32 2.0, %v1466_v20 }
 0x3d0   :  { %v1468_v26 = vmul.f32 %v2148_v28, %v1467_v25 }
 0x3d2   :  { %v1485_v24 = vmul.f32 %v2585_v56, %v1468_v26  ;;  %v1470_v32 = vrot.slane %v1468_v26, 1  ;;  %v1471_v63 = vrot.slane %v1468_v26, 2  ;;  %v1472_v37 = vrot.slane %v1468_v26, 3 }
 0x3d3   :  { %v1474_v33 = vrot.slane %v1468_v26, 5  ;;  %v1473_v39 = vrot.slane %v1468_v26, 4  ;;  %v1475_v23 = vrot.slane %v1468_v26, 6  ;;  %v1476_v2 = vrot.slane %v1468_v26, 7 }
 0x3d4   :  { %v1648_v45 = vrot.slane %v1485_v24, %v2468_v7  ;;  %v1486_v35 = vmul.f32 %v2575_v40, %v1470_v32  ;;  %v1487_v46 = vmul.f32 %v2580_v47, %v1471_v63  ;;  %v1488_v11 = vmul.f32 %v2591_v36, %v1472_v37 }
 0x3d5   :  { %v2660_v27 = vmul.f32 %v2597_v62, %v1473_v39  ;;  %v2664_v38 = vmul.f32 %v2603_v13, %v1474_v33  ;;  %v2667_v50 = vmul.f32 %v2607_v18, %v1475_v23  ;;  %v2672_v62 = vmul.f32 %v2615_v19, %v1476_v2 }
 0x3d6   :  { %1650 = vbcast.lane.b32.xlu1 %v1648_v45, 256  ;;  %v1655_v56 = vrot.slane %v1486_v35, %v2468_v7  ;;  %v1863_v4 = vrot.slane %v1486_v35, 7  ;;  %v1865_v51 = vrot.slane %v1487_v46, 6  ;;  %v1662_v47 = vrot.slane %v1487_v46, %v2468_v7 }
 0x3d7   :  { %v1867_v36 = vrot.slane %v1488_v11, 5  ;;  %v1869_v54 = vrot.slane %v2660_v27, 4  ;;  %v1669_v13 = vrot.slane %v1488_v11, %v2468_v7  ;;  %v1871_v18 = vrot.slane %v2664_v38, 3 }
 0x3d8   :  { %v1864_v40 = vsel %vm1048_vm5, %v1863_v4, %v1485_v24  ;;  %1657 = vbcast.lane.b32.xlu0 %v1655_v56, 256  ;;  %v1873_v57 = vrot.slane %v2667_v50, 2  ;;  %v1875_v19 = vrot.slane %v2672_v62, 1  ;;  %v1690_v58 = vrot.slane %v2667_v50, %v2468_v7 }
 0x3d9   :  { %v1866_v10 = vsel %vm1050_vm6, %v1865_v51, %v1864_v40 }
 0x3da   :  { %1664 = vbcast.lane.b32.xlu1 %v1662_v47, 256  ;;  %v1868_v15 = vsel %vm1052_vm9, %v1867_v36, %v1866_v10  ;;  %v2154_v47 = vld [vmem:[%s2886_s1 + $0x18] sm:$0xff] }
 0x3db   :  { %v1870_v44 = vsel %vm1054_vm10, %v1869_v54, %v1868_v15 }
 0x3dc   :  { %1671 = vbcast.lane.b32.xlu0 %v1669_v13, 256  ;;  %v1872_v14 = vsel %vm1056_vm12, %v1871_v18, %v1870_v44  ;;  %v2155_v44 = vld [vmem:[%s2885_s0] sm:$0xff] }
 0x3dd   :  { %v1874_v3 = vsel %vm1058_vm13, %v1873_v57, %v1872_v14  ;;  %v2156_v14 = vld [vmem:[%s2885_s0 + $0x8] sm:$0xff] }
 0x3de   :  { %v1876_v12 = vsel %vm2897_vm4, %v1875_v19, %v1874_v3 }
 0x3df   :  { %1878 = vst.msk [vmem:[%s2887_s5] sm:$0xff] %vm2898_vm14, %v1876_v12 }
 0x438   :  { %v1302_v28 = vpop.xlane.xlu1 %1301 }
 0x439   :  { %2149 = vrcp.f32 %v1302_v28 }
 0x446   :  { %v2150_v20 = vpop.eup %2149 }
 0x447   :  { %v1304_v25 = vmul.f32 %v2150_v20, %v1302_v28 }
 0x449   :  { %v1305_v26 = vsub.f32 2.0, %v1304_v25 }
 0x44b   :  { %v1306_v24 = vmul.f32 %v2150_v20, %v1305_v26 }
 0x44d   :  { %v1311_v32 = vrot.slane %v1306_v24, %v2468_v7  ;;  %v1315_v33 = vrot.slane %v1306_v24, %v1074_v9  ;;  %v1319_v2 = vrot.slane %v1306_v24, %v1078_v21 }
 0x44f   :  { %v1349_v63 = vmul.f32 %v2520_v59, %v1311_v32  ;;  %v1348_v37 = vmul.f32 %v2516_v5, %v1311_v32  ;;  %v1350_v39 = vmul.f32 %v2527_v6, %v1315_v33  ;;  %v1351_v23 = vmul.f32 %v2532_v17, %v1315_v33 }
 0x450   :  { %v1352_v45 = vmul.f32 %v2544_v30, %v1319_v2  ;;  %v1353_v59 = vmul.f32 %v2555_v42, %v1319_v2  ;;  %v1323_v5 = vrot.slane %v1306_v24, %v1082_v0  ;;  %v1327_v17 = vrot.slane %v1306_v24, %v1086_v16 }
 0x451   :  { %1500 = vperm.xlu1 %2066, %v1349_v63   ;;  %1495 = vperm.xlu0 %2065, %v1348_v37   ;;  %v1331_v42 = vrot.slane %v1306_v24, %v1090_v22  ;;  %v2157_v37 = vld [vmem:[%s2885_s0 + $0x18] sm:$0xff] }
 0x452   :  { %v1354_v9 = vmul.f32 %v2566_v48, %v1323_v5  ;;  %v1355_v6 = vmul.f32 %v2577_v53, %v1323_v5  ;;  %v1356_v21 = vmul.f32 %v2583_v55, %v1327_v17  ;;  %v1357_v30 = vmul.f32 %v2536_v8, %v1327_v17  ;;  %v2160_v5 = vld [vmem:[%s2885_s0 + $0x20] sm:$0xff] }
 0x453   :  { %v1358_v0 = vmul.f32 %v2593_v60, %v1331_v42  ;;  %v1359_v48 = vmul.f32 %v2548_v34, %v1331_v42  ;;  %v1335_v53 = vrot.slane %v1306_v24, %v1094_v31  ;;  %v1339_v8 = vrot.slane %v1306_v24, %v1098_v41 }
 0x454   :  { %v1683_v60 = vrot.slane %v2664_v38, %v2468_v7  ;;  %v1676_v31 = vrot.slane %v2660_v27, %v2468_v7  ;;  %v1697_v41 = vrot.slane %v2672_v62, %v2468_v7  ;;  %v2153_v7 = vld [vmem:[%s2886_s1 + $0x10] sm:$0xff] }
 0x455   :  { %1505 = vperm.xlu1 %2066, %v1350_v39   ;;  %1510 = vperm.xlu0 %2065, %v1351_v23   ;;  %v1360_v16 = vmul.f32 %v2600_v52, %v1335_v53  ;;  %v1361_v55 = vmul.f32 %v2559_v43, %v1335_v53  ;;  %v1362_v22 = vmul.f32 %v2610_v29, %v1339_v8  ;;  %v1651_v43 = vpop.permute.xlu1 %1650  ;;  %v1658_v52 = vpop.permute.xlu0 %1657  ;;  %v2151_v29 = vld [vmem:[%s2886_s1 + $0x8] sm:$0xff]  ;;  %v2158_v39 = vld [vmem:[%s2885_s0 + $0x10] sm:$0xff]  ;;  %v2161_v53 = vld [vmem:[%s2885_s0 + $0x38] sm:$0xff] }
 0x456   :  { %v1363_v34 = vmul.f32 %v2570_v49, %v1339_v8  ;;  %v1702_v35 = vmul.f32 %v2151_v29, %v1658_v52  ;;  %v2152_v49 = vld [vmem:[%s2886_s1] sm:$0xff] }
 0x457   :  { %v1701_v46 = vmul.f32 %v2152_v49, %v1651_v43 }
 0x458   :  { %v1715_v27 = vrot.slane %v1702_v35, 4 }
 0x459   :  { %1515 = vperm.xlu1 %2066, %v1352_v45   ;;  %1520 = vperm.xlu0 %2065, %v1353_v59   ;;  %v1665_v11 = vpop.permute.xlu1 %1664  ;;  %v1709_v56 = vrot.slane %v1701_v46, 4  ;;  %v1672_v51 = vpop.permute.xlu0 %1671  ;;  %v2159_v45 = vld [vmem:[%s2885_s0 + $0x28] sm:$0xff] }
 0x45a   :  { %v1703_v4 = vmul.f32 %v2153_v7, %v1665_v11  ;;  %v1716_v38 = vadd.f32 %v1715_v27, %v1702_v35  ;;  %v1704_v36 = vmul.f32 %v2154_v47, %v1672_v51 }
 0x45b   :  { %v1710_v50 = vadd.f32 %v1709_v56, %v1701_v46  ;;  %v2163_v56 = vld [vmem:[%s2885_s0 + $0x48] sm:$0xff] }
 0x45c   :  { %v1721_v40 = vrot.slane %v1703_v4, 4  ;;  %v1717_v54 = vrot.slane %v1716_v38, 2  ;;  %v1727_v18 = vrot.slane %v1704_v36, 4 }
 0x45d   :  { %1525 = vperm.xlu1 %2066, %v1354_v9   ;;  %1530 = vperm.xlu0 %2065, %v1355_v6   ;;  %v1711_v13 = vrot.slane %v1710_v50, 2 }
 0x45e   :  { %v1722_v15 = vadd.f32 %v1721_v40, %v1703_v4  ;;  %v1718_v28 = vadd.f32 %v1717_v54, %v1716_v38  ;;  %v1728_v26 = vadd.f32 %v1727_v18, %v1704_v36  ;;  %v2164_v38 = vld [vmem:[%s2885_s0 + $0x40] sm:$0xff] }
 0x45f   :  { %v1712_v20 = vadd.f32 %v1711_v13, %v1710_v50 }
 0x460   :  { %v1723_v25 = vrot.slane %v1722_v15, 2  ;;  %v1719_v2 = vrot.slane %v1718_v28, 1 }
 0x461   :  { %1535 = vperm.xlu1 %2066, %v1356_v21   ;;  %1540 = vperm.xlu0 %2065, %v1357_v30   ;;  %v1713_v6 = vrot.slane %v1712_v20, 1  ;;  %v1729_v21 = vrot.slane %v1728_v26, 2 }
 0x462   :  { %v1724_v17 = vadd.f32 %v1723_v25, %v1722_v15 }
 0x465   :  { %1545 = vperm.xlu1 %2066, %v1358_v0   ;;  %1550 = vperm.xlu0 %2065, %v1359_v48  }
 0x469   :  { %1555 = vperm.xlu1 %2066, %v1360_v16   ;;  %1560 = vperm.xlu0 %2065, %v1361_v55   ;;  %v1720_v55 = vadd.f32 %v1719_v2, %v1718_v28 }
 0x46d   :  { %1565 = vperm.xlu1 %2066, %v1362_v22   ;;  %1685 = vbcast.lane.b32.xlu0 %v1683_v60, 256  ;;  %v2162_v22 = vld [vmem:[%s2885_s0 + $0x30] sm:$0xff] }
 0x471   :  { %1678 = vbcast.lane.b32.xlu1 %v1676_v31, 256  ;;  %1570 = vperm.xlu0 %2065, %v1363_v34   ;;  %v1714_v31 = vadd.f32 %v1713_v6, %v1712_v20  ;;  %v1725_v34 = vrot.slane %v1724_v17, 1 }
 0x473   :  { %v1887_v4 = vsel %vm1048_vm5, %v1720_v55, %v1714_v31  ;;  %v1726_v40 = vadd.f32 %v1725_v34, %v1724_v17  ;;  %v2167_v17 = vld [vmem:[%s2885_s0 + $0x68] sm:$0xff] }
 0x475   :  { %1692 = vbcast.lane.b32.xlu1 %v1690_v58, 256  ;;  %1699 = vbcast.lane.b32.xlu0 %v1697_v41, 256  ;;  %v2776_v58 = vadd.f32 %v1729_v21, %v1728_v26  ;;  %v2166_v26 = vld [vmem:[%s2885_s0 + $0x50] sm:$0xff] }
 0x477   :  { %v1731_v47 = vrot.slane %v2776_v58, 1 }
 0x4cc   :  { %v2740_v62 = vpop.permute.xlu0 %1495  ;;  %v2742_v10 = vpop.permute.xlu1 %1500 }
 0x4cd   :  { %v1573_v57 = vmul.f32 %v2155_v44, %v2740_v62  ;;  %v1574_v19 = vmul.f32 %v2156_v14, %v2742_v10  ;;  %v1760_v36 = vrot.slane %v2740_v62, %v2382_v61  ;;  %v1764_v54 = vrot.slane %v2742_v10, %v2389_v1  ;;  %v2165_v62 = vld [vmem:[%s2885_s0 + $0x58] sm:$0xff] }
 0x4cf   :  { %v1589_v24 = vadd.f32 %v1574_v19, %v1573_v57 }
 0x4d0   :  { %v1511_v3 = vpop.permute.xlu0 %1510  ;;  %v1506_v12 = vpop.permute.xlu1 %1505 }
 0x4d1   :  { %v1576_v33 = vmul.f32 %v2157_v37, %v1511_v3  ;;  %v1575_v23 = vmul.f32 %v2158_v39, %v1506_v12  ;;  %v1590_v30 = vrot.slane %v1589_v24, 4  ;;  %v1773_v43 = vrot.slane %v1511_v3, %v2389_v1 }
 0x4d2   :  { %v1769_v52 = vrot.slane %v1506_v12, %v2382_v61 }
 0x4d3   :  { %v1596_v48 = vadd.f32 %v1576_v33, %v1575_v23  ;;  %v1591_v41 = vadd.f32 %v1590_v30, %v1589_v24  ;;  %v2168_v30 = vld [vmem:[%s2885_s0 + $0x60] sm:$0xff] }
 0x4d4   :  { %v1521_v32 = vpop.permute.xlu0 %1520  ;;  %v1516_v63 = vpop.permute.xlu1 %1515  ;;  %v1774_v15 = vsel %vm983_vm0, %v1773_v43, %v1769_v52 }
 0x4d5   :  { %v1578_v59 = vmul.f32 %v2159_v45, %v1521_v32  ;;  %v1577_v9 = vmul.f32 %v2160_v5, %v1516_v63  ;;  %v1597_v46 = vrot.slane %v1596_v48, 4  ;;  %v1782_v11 = vrot.slane %v1521_v32, %v2389_v1 }
 0x4d6   :  { %v1778_v27 = vrot.slane %v1516_v63, %v2382_v61  ;;  %v1592_v13 = vrot.slane %v1591_v41, 2  ;;  %v2807_v32 = vsel %vm1050_vm6, %v1726_v40, %v1887_v4  ;;  %v1765_v63 = vsel %vm983_vm0, %v1764_v54, %v1760_v36 }
 0x4d7   :  { %v1603_v8 = vadd.f32 %v1578_v59, %v1577_v9  ;;  %v1598_v19 = vadd.f32 %v1597_v46, %v1596_v48  ;;  %v1829_v23 = vsel %vm1048_vm5, %v1774_v15, %v1765_v63  ;;  %v2170_v15 = vld [vmem:[%s2885_s0 + $0x70] sm:$0xff] }
 0x4d8   :  { %v2764_v42 = vpop.permute.xlu0 %1530  ;;  %v2766_v0 = vpop.permute.xlu1 %1525  ;;  %v1783_v3 = vsel %vm983_vm0, %v1782_v11, %v1778_v27  ;;  %v2812_v39 = vadd.f32 %v1592_v13, %v1591_v41  ;;  %v2169_v11 = vld [vmem:[%s2886_s1 + $0x28] sm:$0xff] }
 0x4d9   :  { %v1580_v16 = vmul.f32 %v2161_v53, %v2764_v42  ;;  %v1579_v60 = vmul.f32 %v2162_v22, %v2766_v0  ;;  %v1604_v51 = vrot.slane %v1603_v8, 4  ;;  %v1791_v12 = vrot.slane %v2764_v42, %v2389_v1 }
 0x4da   :  { %v1787_v10 = vrot.slane %v2766_v0, %v2382_v61  ;;  %v1599_v9 = vrot.slane %v1598_v19, 2  ;;  %v1830_v6 = vsel %vm1050_vm6, %v1783_v3, %v1829_v23 }
 0x4db   :  { %v1610_v29 = vadd.f32 %v1580_v16, %v1579_v60  ;;  %v1605_v20 = vadd.f32 %v1604_v51, %v1603_v8 }
 0x4dc   :  { %v1541_v35 = vpop.permute.xlu0 %1540  ;;  %v1536_v49 = vpop.permute.xlu1 %1535  ;;  %v1792_v48 = vsel %vm983_vm0, %v1791_v12, %v1787_v10  ;;  %v2171_v12 = vld [vmem:[%s2885_s0 + $0x78] sm:$0xff] }
 0x4dd   :  { %v1582_v7 = vmul.f32 %v2163_v56, %v1541_v35  ;;  %v1581_v50 = vmul.f32 %v2164_v38, %v1536_v49  ;;  %v1611_v18 = vrot.slane %v1610_v29, 4  ;;  %v1800_v37 = vrot.slane %v1541_v35, %v2389_v1 }
 0x4de   :  { %v1796_v33 = vrot.slane %v1536_v49, %v2382_v61  ;;  %v1606_v0 = vrot.slane %v1605_v20, 2  ;;  %v1594_v35 = vrot.slane %v2812_v39, 1  ;;  %v1831_v49 = vsel %vm1052_vm9, %v1792_v48, %v1830_v6 }
 0x4df   :  { %v1617_v44 = vadd.f32 %v1582_v7, %v1581_v50  ;;  %v1612_v2 = vadd.f32 %v1611_v18, %v1610_v29  ;;  %v1600_v56 = vadd.f32 %v1599_v9, %v1598_v19 }
 0x4e0   :  { %v1551_v57 = vpop.permute.xlu0 %1550  ;;  %v1546_v14 = vpop.permute.xlu1 %1545  ;;  %v1801_v55 = vsel %vm983_vm0, %v1800_v37, %v1796_v33  ;;  %v1607_v7 = vadd.f32 %v1606_v0, %v1605_v20 }
 0x4e1   :  { %v1584_v28 = vmul.f32 %v2165_v62, %v1551_v57  ;;  %v1618_v25 = vrot.slane %v1617_v44, 4  ;;  %v1583_v24 = vmul.f32 %v2166_v26, %v1546_v14  ;;  %v1809_v8 = vrot.slane %v1551_v57, %v2389_v1  ;;  %v2172_v26 = vld [vmem:[%s2886_s1 + $0x20] sm:$0xff] }
 0x4e2   :  { %v1805_v22 = vrot.slane %v1546_v14, %v2382_v61  ;;  %v1613_v31 = vrot.slane %v1612_v2, 2  ;;  %v1832_v51 = vsel %vm1054_vm10, %v1801_v55, %v1831_v49  ;;  %v1601_v20 = vrot.slane %v1600_v56, 1 }
 0x4e3   :  { %v1624_v45 = vadd.f32 %v1584_v28, %v1583_v24  ;;  %v1619_v53 = vadd.f32 %v1618_v25, %v1617_v44  ;;  %v1608_v23 = vrot.slane %v1607_v7, 1 }
 0x4e4   :  { %v1561_v59 = vpop.permute.xlu0 %1560  ;;  %v1556_v5 = vpop.permute.xlu1 %1555  ;;  %v1810_v50 = vsel %vm983_vm0, %v1809_v8, %v1805_v22  ;;  %v1614_v54 = vadd.f32 %v1613_v31, %v1612_v2  ;;  %v1602_v55 = vadd.f32 %v1601_v20, %v1600_v56 }
 0x4e5   :  { %v1586_v21 = vmul.f32 %v2167_v17, %v1561_v59  ;;  %v1585_v42 = vmul.f32 %v2168_v30, %v1556_v5  ;;  %v1625_v16 = vrot.slane %v1624_v45, 4  ;;  %v1818_v41 = vrot.slane %v1561_v59, %v2389_v1 }
 0x4e6   :  { %v1814_v43 = vrot.slane %v1556_v5, %v2382_v61  ;;  %v1620_v4 = vrot.slane %v1619_v53, 2  ;;  %v1833_v25 = vsel %vm1056_vm12, %v1810_v50, %v1832_v51  ;;  %v1615_v9 = vrot.slane %v1614_v54, 1 }
 0x4e7   :  { %v1631_v60 = vadd.f32 %v1586_v21, %v1585_v42  ;;  %v1626_v34 = vadd.f32 %v1625_v16, %v1624_v45  ;;  %v2173_v21 = vld [vmem:[%s2886_s1 + $0x38] sm:$0xff]  ;;  %v1595_v42 = vadd.f32 %v1594_v35, %v2812_v39  ;;  %v1609_v31 = vadd.f32 %v1608_v23, %v1607_v7 }
 0x4e8   :  { %v1686_v52 = vpop.permute.xlu0 %1685  ;;  %v1566_v29 = vpop.permute.xlu1 %1565  ;;  %v1819_v13 = vsel %vm983_vm0, %v1818_v41, %v1814_v43  ;;  %v1621_v10 = vadd.f32 %v1620_v4, %v1619_v53  ;;  %v2174_v53 = vld [vmem:[%s2886_s1 + $0x30] sm:$0xff]  ;;  %v1732_v39 = vadd.f32 %v1731_v47, %v2776_v58 }
 0x4e9   :  { %v1632_v46 = vrot.slane %v1631_v60, 4  ;;  %v1706_v27 = vmul.f32 %v2169_v11, %v1686_v52  ;;  %v1627_v38 = vrot.slane %v1626_v34, 2  ;;  %v1587_v18 = vmul.f32 %v2170_v15, %v1566_v29 }
 0x4ea   :  { %v1823_v44 = vrot.slane %v1566_v29, %v2382_v61  ;;  %v1834_v63 = vsel %vm1058_vm13, %v1819_v13, %v1833_v25  ;;  %v1622_v0 = vrot.slane %v1621_v10, 1  ;;  %v1616_v52 = vadd.f32 %v1615_v9, %v1614_v54 }
 0x4eb   :  { %v1633_v40 = vadd.f32 %v1632_v46, %v1631_v60  ;;  %v1739_v36 = vrot.slane %v1706_v27, 4  ;;  %v1628_v24 = vadd.f32 %v1627_v38, %v1626_v34  ;;  %v1846_v56 = vsel %vm1048_vm5, %v1602_v55, %v1595_v42 }
 0x4ec   :  { %v1571_v57 = vpop.permute.xlu0 %1570  ;;  %v1679_v14 = vpop.permute.xlu1 %1678  ;;  %v1623_v35 = vadd.f32 %v1622_v0, %v1621_v10  ;;  %v1847_v7 = vsel %vm1050_vm6, %v1609_v31, %v1846_v56 }
 0x4ed   :  { %v1634_v19 = vrot.slane %v1633_v40, 2  ;;  %v1740_v3 = vadd.f32 %v1739_v36, %v1706_v27  ;;  %v1588_v62 = vmul.f32 %v2171_v12, %v1571_v57  ;;  %v1827_v28 = vrot.slane %v1571_v57, %v2389_v1 }
 0x4ee   :  { %v1705_v61 = vmul.f32 %v2172_v26, %v1679_v14  ;;  %v1629_v8 = vrot.slane %v1628_v24, 1  ;;  %v1848_v54 = vsel %vm1052_vm9, %v1616_v52, %v1847_v7  ;;  %v1889_v57 = vsel %vm1052_vm9, %v1732_v39, %v2807_v32 }
 0x4ef   :  { %v1638_v37 = vadd.f32 %v1588_v62, %v1587_v18  ;;  %v1828_v33 = vsel %vm983_vm0, %v1827_v28, %v1823_v44  ;;  %v1635_v2 = vadd.f32 %v1634_v19, %v1633_v40  ;;  %v1741_v6 = vrot.slane %v1740_v3, 2  ;;  %vm2900_vm0 = vmmov %vm2894_vm1 }
 0x4f0   :  { %v1835_v45 = vsel %vm2899_vm7, %v1828_v33, %v1834_v63  ;;  %v1733_v1 = vrot.slane %v1705_v61, 4  ;;  %v1700_v59 = vpop.permute.xlu0 %1699  ;;  %v1693_v5 = vpop.permute.xlu1 %1692  ;;  %v1630_v4 = vadd.f32 %v1629_v8, %v1628_v24  ;;  %v1849_v58 = vsel %vm1054_vm10, %v1623_v35, %v1848_v54  ;;  %vm2901_vm5 = vmmov %vm2900_vm0 }
 0x4f1   :  { %v1639_v17 = vrot.slane %v1638_v37, 4  ;;  %1837 = vst.msk [vmem:[%s2888_s3] sm:$0xff] %vm1063_vm11, %v1835_v45  ;;  %v1708_v30 = vmul.f32 %v2173_v21, %v1700_v59  ;;  %v1707_v16 = vmul.f32 %v2174_v53, %v1693_v5  ;;  %v1636_v34 = vrot.slane %v1635_v2, 1 }
 0x4f2   :  { %v1734_v48 = vadd.f32 %v1733_v1, %v1705_v61  ;;  %v1742_v29 = vadd.f32 %v1741_v6, %v1740_v3  ;;  %v1850_v14 = vsel %vm1056_vm12, %v1630_v4, %v1849_v58 }
 0x4f3   :  { %v1640_v22 = vadd.f32 %v1639_v17, %v1638_v37  ;;  %v1751_v60 = vrot.slane %v1708_v30, 4  ;;  %v1745_v43 = vrot.slane %v1707_v16, 4  ;;  %v1637_v50 = vadd.f32 %v1636_v34, %v1635_v2 }
 0x4f4   :  { %v1735_v41 = vrot.slane %v1734_v48, 2  ;;  %v1743_v13 = vrot.slane %v1742_v29, 1 }
 0x4f5   :  { %v1641_v49 = vrot.slane %v1640_v22, 2  ;;  %v1752_v46 = vadd.f32 %v1751_v60, %v1708_v30  ;;  %v1746_v27 = vadd.f32 %v1745_v43, %v1707_v16  ;;  %v1851_v12 = vsel %vm1058_vm13, %v1637_v50, %v1850_v14 }
 0x4f6   :  { %v1736_v11 = vadd.f32 %v1735_v41, %v1734_v48  ;;  %v1744_v20 = vadd.f32 %v1743_v13, %v1742_v29 }
 0x4f7   :  { %v1642_v51 = vadd.f32 %v1641_v49, %v1640_v22  ;;  %v1753_v38 = vrot.slane %v1752_v46, 2  ;;  %v1747_v36 = vrot.slane %v1746_v27, 2 }
 0x4f8   :  { %v1737_v40 = vrot.slane %v1736_v11, 1 }
 0x4f9   :  { %v1643_v15 = vrot.slane %v1642_v51, 1  ;;  %v1754_v18 = vadd.f32 %v1753_v38, %v1752_v46  ;;  %v1748_v44 = vadd.f32 %v1747_v36, %v1746_v27 }
 0x4fa   :  { %v1738_v47 = vadd.f32 %v1737_v40, %v1736_v11 }
 0x4fb   :  { %v1644_v19 = vadd.f32 %v1643_v15, %v1642_v51  ;;  %v1755_v3 = vrot.slane %v1754_v18, 1  ;;  %v1749_v28 = vrot.slane %v1748_v44, 1 }
 0x4fc   :  { %v1890_v62 = vsel %vm1054_vm10, %v1738_v47, %v1889_v57 }
 0x4fd   :  { %v1852_v10 = vsel %vm2900_vm0, %v1644_v19, %v1851_v12  ;;  %v1756_v25 = vadd.f32 %v1755_v3, %v1754_v18  ;;  %v1750_v26 = vadd.f32 %v1749_v28, %v1748_v44  ;;  %v1891_v32 = vsel %vm1056_vm12, %v1744_v20, %v1890_v62 }
 0x4fe   :  { %1854 = vst [vmem:[%s2889_s4] sm:$0xff] %v1852_v10 }
 0x4ff   :  { %v1892_v61 = vsel %vm1058_vm13, %v1750_v26, %v1891_v32 }
 0x500   :  { %v1893_v24 = vsel %vm2901_vm5, %v1756_v25, %v1892_v61 }
 0x501   :  { %1895 = vst [vmem:[%s2890_s6] sm:$0xff] %v1893_v24 }

</bundles_post_ra>
